<compile_context>
chip_gen: v6e
topology: v6e:2x2x1
jax: 0.10.0
libtpu: 0.0.40
codegen_flags: <defaults>
</compile_context>

<pallas_src>
import jax
import jax.numpy as jnp
from jax.experimental import pallas as pl
from jax.experimental.pallas import tpu as pltpu

LANE = 128
SUBLANE = 8
MAX_CHUNK = 32


def _round_up(x, m):
    return (x + m - 1) // m * m


def _combiner_rnn_kernel(w1_ref, w2_ref, h0_ref,
                         W1_ref, b1_ref, W2_ref, b2_ref,
                         Wih1_ref, Wih2_ref, bgi_ref,
                         Whh_ref, bhn_ref,
                         out_ref, h_vmem):
    Hp = h0_ref.shape[-1]
    chunk = w1_ref.shape[0]

    @pl.when(pl.program_id(0) == 0)
    def _():
        h_vmem[...] = h0_ref[...]

    # ---------- Batched (M = CHUNK) word path, hoisted off the recurrence ----
    x1 = jnp.maximum(
        jnp.dot(w1_ref[...].astype(W1_ref.dtype), W1_ref[...],
                preferred_element_type=jnp.float32) + b1_ref[...], 0.0)
    x2 = jnp.maximum(
        jnp.dot(w2_ref[...].astype(W2_ref.dtype), W2_ref[...],
                preferred_element_type=jnp.float32) + b2_ref[...], 0.0)
    # gi = concat([x1, x2]) @ W_ih + (b_ih with b_hh folded for r/z gates);
    # the lane concat is replaced by a split contraction.
    gi = (jnp.dot(x1.astype(Wih1_ref.dtype), Wih1_ref[...],
                  preferred_element_type=jnp.float32)
          + jnp.dot(x2.astype(Wih2_ref.dtype), Wih2_ref[...],
                    preferred_element_type=jnp.float32)
          + bgi_ref[...])                                  # (chunk, 3Hp)

    bhn = bhn_ref[...]                                     # (1, Hp)

    # ---------- Serial recurrence: gh = h @ Whh + gate math per step ---------
    h = h_vmem[...]                                        # (1, Hp) f32 carry
    for i in range(chunk):                                 # static unroll
        gh = jnp.dot(h.astype(Whh_ref.dtype), Whh_ref[...],
                     preferred_element_type=jnp.float32)   # (1, 3Hp), no bias
        gi_i = gi[i:i + 1, :]
        # Gate slices are 128-aligned because Hp is a multiple of 128.
        r = jax.nn.sigmoid(gi_i[:, 0:Hp] + gh[:, 0:Hp])
        z = jax.nn.sigmoid(gi_i[:, Hp:2 * Hp] + gh[:, Hp:2 * Hp])
        n = jnp.tanh(gi_i[:, 2 * Hp:3 * Hp] + r * (gh[:, 2 * Hp:3 * Hp] + bhn))
        h = (1.0 - z) * n + z * h                          # f32 (v5e-safe)
        out_ref[i:i + 1, :] = h
    h_vmem[...] = h


def combiner_rnn_scan(words1, words2, hidden, packed, chunk=None):
    """Run T recurrent CombinerRNN steps in a single pallas_call.

    words1, words2: (T, H) f32; hidden: reshapeable to (1, H).
    Returns (per-step hiddens (T, H), final hidden (1, 1, H))."""
    H, Hp = packed["H"], packed["Hp"]
    T = words1.shape[0]
    if chunk is None:
        chunk = min(_round_up(T, SUBLANE), MAX_CHUNK)
    Tpad = _round_up(T, chunk)

    w1p = jnp.zeros((Tpad, Hp), jnp.float32)
    w1p = w1p.at[:T, :H].set(words1.reshape(T, H).astype(jnp.float32))
    w2p = jnp.zeros((Tpad, Hp), jnp.float32)
    w2p = w2p.at[:T, :H].set(words2.reshape(T, H).astype(jnp.float32))
    h0 = jnp.zeros((1, Hp), jnp.float32)
    h0 = h0.at[:, :H].set(hidden.reshape(1, H).astype(jnp.float32))

    wd = jnp.dtype(packed["W1"].dtype).itemsize
    weight_bytes = (packed["W1"].size + packed["W2"].size + packed["Wih1"].size
                    + packed["Wih2"].size + packed["Whh"].size) * wd
    bias_bytes = (packed["b1"].size + packed["b2"].size + packed["bgi"].size
                  + packed["bhn"].size) * 4
    cost = pl.CostEstimate(
        flops=22 * Tpad * Hp * Hp,
        transcendentals=3 * Tpad * Hp,
        bytes_accessed=int(weight_bytes + bias_bytes
                           + (w1p.size + w2p.size + h0.size + Tpad * Hp) * 4),
    )

    const = lambda c: (0, 0)        # resident blocks (DMA'd once)
    stream = lambda c: (c, 0)       # per-chunk streamed blocks

    hiddens_p = pl.pallas_call(
        _combiner_rnn_kernel,
        out_shape=jax.ShapeDtypeStruct((Tpad, Hp), jnp.float32),
        grid=(Tpad // chunk,),
        in_specs=[
            pl.BlockSpec((chunk, Hp), stream),        # words1 chunk
            pl.BlockSpec((chunk, Hp), stream),        # words2 chunk
            pl.BlockSpec((1, Hp), const),             # h0
            pl.BlockSpec((Hp, Hp), const),            # W1
            pl.BlockSpec((1, Hp), const),             # b1
            pl.BlockSpec((Hp, Hp), const),            # W2
            pl.BlockSpec((1, Hp), const),             # b2
            pl.BlockSpec((Hp, 3 * Hp), const),        # W_ih (word1 half)
            pl.BlockSpec((Hp, 3 * Hp), const),        # W_ih (word2 half)
            pl.BlockSpec((1, 3 * Hp), const),         # folded gate bias
            pl.BlockSpec((Hp, 3 * Hp), const),        # W_hh
            pl.BlockSpec((1, Hp), const),             # b_hh (n gate only)
        ],
        out_specs=pl.BlockSpec((chunk, Hp), stream),
        scratch_shapes=[pltpu.VMEM((1, Hp), jnp.float32)],   # hidden carry
        compiler_params=pltpu.CompilerParams(
            dimension_semantics=("arbitrary",)),             # true recurrence
        cost_estimate=cost,
    )(w1p, w2p, h0,
      packed["W1"], packed["b1"], packed["W2"], packed["b2"],
      packed["Wih1"], packed["Wih2"], packed["bgi"],
      packed["Whh"], packed["bhn"])

    hiddens = hiddens_p[:T, :H]                              # single final slice
    final_hidden = hiddens[T - 1].reshape(1, 1, H)
    return hiddens, final_hidden


def combiner_rnn_forward(word1, word2, hidden, packed, combine=False):
    """Module-compatible single-step forward (T = 1 case of the scan)."""
    H = packed["H"]
    _, new_hidden = combiner_rnn_scan(word1.reshape(1, H), word2.reshape(1, H),
                                      hidden, packed)
    if combine:
        # 1-step, 1-layer GRU: output == new hidden state (same values).
        return new_hidden, new_hidden
    return new_hidden


def init_raw_params(key, H):
    """PyTorch-shaped logical parameters, stored transposed (in, out)."""
    ks = jax.random.split(key, 8)
    s = 1.0 / jnp.sqrt(jnp.float32(H))
    u = lambda k, shape: jax.random.uniform(k, shape, jnp.float32, -s, s)
    return {
        "W1_w": u(ks[0], (H, H)), "W1_b": u(ks[1], (H,)),
        "W2_w": u(ks[2], (H, H)), "W2_b": u(ks[3], (H,)),
        "gru_w_ih": u(ks[4], (2 * H, 3 * H)),   # gates [r|z|n] along output axis
        "gru_b_ih": u(ks[5], (3 * H,)),
        "gru_w_hh": u(ks[6], (H, 3 * H)),
        "gru_b_hh": u(ks[7], (3 * H,)),
    }


def pack_params(raw, H, weight_dtype=jnp.bfloat16):
    """One-time layout conversion: pad H -> Hp (multiple of 128), place each
    gate in its own 128-aligned block, split W_ih into word1/word2 halves
    (removes the concat), fold the r/z gate biases (b_ih + b_hh), cast matmul
    weights to bf16 (biases stay f32).  All padding lanes are exactly zero --
    required so padded hidden lanes stay zero across the recurrence."""
    Hp = _round_up(H, LANE)

    def pad_mat(W, rows):                      # (r, c) -> (rows, Hp), zero pad
        out = jnp.zeros((rows, Hp), jnp.float32)
        return out.at[:W.shape[0], :W.shape[1]].set(W)

    def pad_gate_cols(W):                      # (r, 3H) -> (r, 3Hp), aligned gates
        out = jnp.zeros((W.shape[0], 3 * Hp), jnp.float32)
        for g in range(3):
            out = out.at[:, g * Hp:g * Hp + H].set(W[:, g * H:(g + 1) * H])
        return out

    def pad_rows(W, rows):
        return jnp.pad(W, ((0, rows - W.shape[0]), (0, 0)))

    def pad_vec(b):                            # (H,) -> (1, Hp)
        return jnp.zeros((1, Hp), jnp.float32).at[0, :H].set(b)

    b_ih, b_hh = raw["gru_b_ih"], raw["gru_b_hh"]
    bgi = jnp.zeros((1, 3 * Hp), jnp.float32)
    bgi = bgi.at[0, 0 * Hp:0 * Hp + H].set(b_ih[0 * H:1 * H] + b_hh[0 * H:1 * H])  # r
    bgi = bgi.at[0, 1 * Hp:1 * Hp + H].set(b_ih[1 * H:2 * H] + b_hh[1 * H:2 * H])  # z
    bgi = bgi.at[0, 2 * Hp:2 * Hp + H].set(b_ih[2 * H:3 * H])                      # n (input part)

    return {
        "H": H, "Hp": Hp,
        "W1": pad_mat(raw["W1_w"], Hp).astype(weight_dtype), "b1": pad_vec(raw["W1_b"]),
        "W2": pad_mat(raw["W2_w"], Hp).astype(weight_dtype), "b2": pad_vec(raw["W2_b"]),
        "Wih1": pad_rows(pad_gate_cols(raw["gru_w_ih"][:H]), Hp).astype(weight_dtype),
        "Wih2": pad_rows(pad_gate_cols(raw["gru_w_ih"][H:]), Hp).astype(weight_dtype),
        "bgi": bgi,
        "Whh": pad_rows(pad_gate_cols(raw["gru_w_hh"]), Hp).astype(weight_dtype),
        "bhn": pad_vec(b_hh[2 * H:3 * H]),
    }


def _reference_scan(words1, words2, hidden, raw, weight_dtype=jnp.bfloat16):
    """Pure-JAX reference mirroring PyTorch GRU semantics and the kernel's
    bf16-weight / f32-accumulate matmul precision."""
    H = raw["W1_w"].shape[0]
    T = words1.shape[0]

    def dot(a, b):
        return jnp.dot(a.astype(weight_dtype), b.astype(weight_dtype),
                       preferred_element_type=jnp.float32)

    h = hidden.reshape(1, H).astype(jnp.float32)
    outs = []
    for t in range(T):
        w1 = words1[t].reshape(1, H)
        w2 = words2[t].reshape(1, H)
        x1 = jnp.maximum(dot(w1, raw["W1_w"]) + raw["W1_b"], 0.0)
        x2 = jnp.maximum(dot(w2, raw["W2_w"]) + raw["W2_b"], 0.0)
        x = jnp.concatenate([x1, x2], axis=-1)
        gi = dot(x, raw["gru_w_ih"]) + raw["gru_b_ih"]
        gh = dot(h, raw["gru_w_hh"]) + raw["gru_b_hh"]
        r = jax.nn.sigmoid(gi[:, :H] + gh[:, :H])
        z = jax.nn.sigmoid(gi[:, H:2 * H] + gh[:, H:2 * H])
        n = jnp.tanh(gi[:, 2 * H:] + r * gh[:, 2 * H:])
        h = (1.0 - z) * n + z * h
        outs.append(h[0])
    return jnp.stack(outs), h.reshape(1, 1, H)


if __name__ == "__main__":
    H = 32   # small test size (module default is 300 -> Hp = 384)
    T = 8    # sequence length for the chunked recurrent kernel

    key = jax.random.PRNGKey(0)
    k_params, k_w1, k_w2 = jax.random.split(key, 3)

    raw = init_raw_params(k_params, H)
    packed = pack_params(raw, H)                 # one-time layout conversion

    words1 = jax.random.normal(k_w1, (T, H), jnp.float32)
    words2 = jax.random.normal(k_w2, (T, H), jnp.float32)
    hidden0 = jnp.zeros((1, 1, H), jnp.float32)  # initHidden()

    # Multi-step path: one pallas_call runs the whole recurrence.
    hiddens, final_hidden = combiner_rnn_scan(words1, words2, hidden0, packed)
    hiddens = jax.block_until_ready(hiddens)

    # Module-compatible single-step paths (combine=False and combine=True).
    h1 = combiner_rnn_forward(words1[0], words2[0], hidden0, packed, combine=False)
    out1, h1b = combiner_rnn_forward(words1[0], words2[0], hidden0, packed,
                                     combine=True)
    h1 = jax.block_until_ready(h1)

    ref_hiddens, ref_final = _reference_scan(words1, words2, hidden0, raw)

    assert hiddens.shape == (T, H)
    assert final_hidden.shape == (1, 1, H)
    assert h1.shape == (1, 1, H) and out1.shape == (1, 1, H)
    assert jnp.allclose(hiddens, ref_hiddens, atol=1e-3, rtol=1e-3), "scan mismatch"
    assert jnp.allclose(final_hidden, ref_final, atol=1e-3, rtol=1e-3), "final mismatch"
    assert jnp.allclose(h1.reshape(H), ref_hiddens[0], atol=1e-3, rtol=1e-3), "step mismatch"
    assert jnp.allclose(out1, h1b), "combine outputs differ"

    print("KERNEL_OK")
</pallas_src>

<mosaic_0001>
module attributes {stable_mosaic.version = 11 : i64} {
  func.func @_combiner_rnn_kernel(%arg0: i32, %arg1: memref<8x128xf32, #tpu.memory_space<vmem>>, %arg2: memref<8x128xf32, #tpu.memory_space<vmem>>, %arg3: memref<1x128xf32, #tpu.memory_space<vmem>>, %arg4: memref<128x128xbf16, #tpu.memory_space<vmem>>, %arg5: memref<1x128xf32, #tpu.memory_space<vmem>>, %arg6: memref<128x128xbf16, #tpu.memory_space<vmem>>, %arg7: memref<1x128xf32, #tpu.memory_space<vmem>>, %arg8: memref<128x384xbf16, #tpu.memory_space<vmem>>, %arg9: memref<128x384xbf16, #tpu.memory_space<vmem>>, %arg10: memref<1x384xf32, #tpu.memory_space<vmem>>, %arg11: memref<128x384xbf16, #tpu.memory_space<vmem>>, %arg12: memref<1x128xf32, #tpu.memory_space<vmem>>, %arg13: memref<8x128xf32, #tpu.memory_space<vmem>>, %arg14: memref<1x128xf32, #tpu.memory_space<vmem>>) attributes {dimension_semantics = [#tpu.dimension_semantics<arbitrary>], iteration_bounds = array<i64: 1>, scalar_prefetch = 0 : i64, scratch_operands = 1 : i64, tpu.core_type = #tpu.core_type<tc>, window_params = [{transform_indices = @transform_0, window_bounds = array<i64: 8, 128>}, {transform_indices = @transform_1, window_bounds = array<i64: 8, 128>}, {pipeline_mode = #tpu.pipeline_mode<synchronous>, transform_indices = @transform_2, window_bounds = array<i64: 1, 128>}, {pipeline_mode = #tpu.pipeline_mode<synchronous>, transform_indices = @transform_3, window_bounds = array<i64: 128, 128>}, {pipeline_mode = #tpu.pipeline_mode<synchronous>, transform_indices = @transform_4, window_bounds = array<i64: 1, 128>}, {pipeline_mode = #tpu.pipeline_mode<synchronous>, transform_indices = @transform_5, window_bounds = array<i64: 128, 128>}, {pipeline_mode = #tpu.pipeline_mode<synchronous>, transform_indices = @transform_6, window_bounds = array<i64: 1, 128>}, {pipeline_mode = #tpu.pipeline_mode<synchronous>, transform_indices = @transform_7, window_bounds = array<i64: 128, 384>}, {pipeline_mode = #tpu.pipeline_mode<synchronous>, transform_indices = @transform_8, window_bounds = array<i64: 128, 384>}, {pipeline_mode = #tpu.pipeline_mode<synchronous>, transform_indices = @transform_9, window_bounds = array<i64: 1, 384>}, {pipeline_mode = #tpu.pipeline_mode<synchronous>, transform_indices = @transform_10, window_bounds = array<i64: 128, 384>}, {pipeline_mode = #tpu.pipeline_mode<synchronous>, transform_indices = @transform_11, window_bounds = array<i64: 1, 128>}, {transform_indices = @transform_12, window_bounds = array<i64: 8, 128>}]} {
    %c0_i32 = arith.constant 0 : i32
    %0 = arith.cmpi eq, %arg0, %c0_i32 : i32
    %1 = arith.extui %0 : i1 to i32
    %c0_i32_0 = arith.constant 0 : i32
    %2 = arith.cmpi ne, %1, %c0_i32_0 : i32
    scf.if %2 {
      %c0_86 = arith.constant 0 : index
      %c0_87 = arith.constant 0 : index
      %290 = vector.load %arg3[%c0_86, %c0_87] : memref<1x128xf32, #tpu.memory_space<vmem>>, vector<1x128xf32>
      %c0_88 = arith.constant 0 : index
      %c0_89 = arith.constant 0 : index
      %291 = vector.load %arg14[%c0_88, %c0_89] : memref<1x128xf32, #tpu.memory_space<vmem>>, vector<1x128xf32>
      tpu.vector_store %arg14[%c0_88, %c0_89], %290 {strides = array<i32>} : memref<1x128xf32, #tpu.memory_space<vmem>>, vector<1x128xf32>,
    } else {
    }
    %c0 = arith.constant 0 : index
    %c0_1 = arith.constant 0 : index
    %3 = vector.load %arg1[%c0, %c0_1] : memref<8x128xf32, #tpu.memory_space<vmem>>, vector<8x128xf32>
    %4 = arith.truncf %3 : vector<8x128xf32> to vector<8x128xbf16>
    %c0_2 = arith.constant 0 : index
    %c0_3 = arith.constant 0 : index
    %5 = vector.load %arg4[%c0_2, %c0_3] : memref<128x128xbf16, #tpu.memory_space<vmem>>, vector<128x128xbf16>
    %cst = arith.constant dense<0.000000e+00> : vector<8x128xf32>
    %6 = tpu.matmul %4, %5, %cst {dimension_numbers = #tpu.dot_dimension_numbers<[1], [0], [0], [1], [0, 0, 1, 1], [], []>} : vector<8x128xbf16>, vector<128x128xbf16>, vector<8x128xf32> -> vector<8x128xf32>
    %c0_4 = arith.constant 0 : index
    %c0_5 = arith.constant 0 : index
    %7 = vector.load %arg5[%c0_4, %c0_5] : memref<1x128xf32, #tpu.memory_space<vmem>>, vector<1x128xf32>
    %8 = vector.broadcast %7 : vector<1x128xf32> to vector<8x128xf32>
    %9 = arith.addf %6, %8 : vector<8x128xf32>
    %cst_6 = arith.constant 0.000000e+00 : f32
    %10 = vector.broadcast %cst_6 : f32 to vector<8x128xf32>
    %11 = arith.maximumf %9, %10 : vector<8x128xf32>
    %c0_7 = arith.constant 0 : index
    %c0_8 = arith.constant 0 : index
    %12 = vector.load %arg2[%c0_7, %c0_8] : memref<8x128xf32, #tpu.memory_space<vmem>>, vector<8x128xf32>
    %13 = arith.truncf %12 : vector<8x128xf32> to vector<8x128xbf16>
    %c0_9 = arith.constant 0 : index
    %c0_10 = arith.constant 0 : index
    %14 = vector.load %arg6[%c0_9, %c0_10] : memref<128x128xbf16, #tpu.memory_space<vmem>>, vector<128x128xbf16>
    %cst_11 = arith.constant dense<0.000000e+00> : vector<8x128xf32>
    %15 = tpu.matmul %13, %14, %cst_11 {dimension_numbers = #tpu.dot_dimension_numbers<[1], [0], [0], [1], [0, 0, 1, 1], [], []>} : vector<8x128xbf16>, vector<128x128xbf16>, vector<8x128xf32> -> vector<8x128xf32>
    %c0_12 = arith.constant 0 : index
    %c0_13 = arith.constant 0 : index
    %16 = vector.load %arg7[%c0_12, %c0_13] : memref<1x128xf32, #tpu.memory_space<vmem>>, vector<1x128xf32>
    %17 = vector.broadcast %16 : vector<1x128xf32> to vector<8x128xf32>
    %18 = arith.addf %15, %17 : vector<8x128xf32>
    %cst_14 = arith.constant 0.000000e+00 : f32
    %19 = vector.broadcast %cst_14 : f32 to vector<8x128xf32>
    %20 = arith.maximumf %18, %19 : vector<8x128xf32>
    %21 = arith.truncf %11 : vector<8x128xf32> to vector<8x128xbf16>
    %c0_15 = arith.constant 0 : index
    %c0_16 = arith.constant 0 : index
    %22 = vector.load %arg8[%c0_15, %c0_16] : memref<128x384xbf16, #tpu.memory_space<vmem>>, vector<128x384xbf16>
    %cst_17 = arith.constant dense<0.000000e+00> : vector<8x384xf32>
    %23 = tpu.matmul %21, %22, %cst_17 {dimension_numbers = #tpu.dot_dimension_numbers<[1], [0], [0], [1], [0, 0, 1, 1], [], []>} : vector<8x128xbf16>, vector<128x384xbf16>, vector<8x384xf32> -> vector<8x384xf32>
    %24 = arith.truncf %20 : vector<8x128xf32> to vector<8x128xbf16>
    %c0_18 = arith.constant 0 : index
    %c0_19 = arith.constant 0 : index
    %25 = vector.load %arg9[%c0_18, %c0_19] : memref<128x384xbf16, #tpu.memory_space<vmem>>, vector<128x384xbf16>
    %cst_20 = arith.constant dense<0.000000e+00> : vector<8x384xf32>
    %26 = tpu.matmul %24, %25, %cst_20 {dimension_numbers = #tpu.dot_dimension_numbers<[1], [0], [0], [1], [0, 0, 1, 1], [], []>} : vector<8x128xbf16>, vector<128x384xbf16>, vector<8x384xf32> -> vector<8x384xf32>
    %27 = arith.addf %23, %26 : vector<8x384xf32>
    %c0_21 = arith.constant 0 : index
    %c0_22 = arith.constant 0 : index
    %28 = vector.load %arg10[%c0_21, %c0_22] : memref<1x384xf32, #tpu.memory_space<vmem>>, vector<1x384xf32>
    %29 = vector.broadcast %28 : vector<1x384xf32> to vector<8x384xf32>
    %30 = arith.addf %27, %29 : vector<8x384xf32>
    %c0_23 = arith.constant 0 : index
    %c0_24 = arith.constant 0 : index
    %31 = vector.load %arg12[%c0_23, %c0_24] : memref<1x128xf32, #tpu.memory_space<vmem>>, vector<1x128xf32>
    %c0_25 = arith.constant 0 : index
    %c0_26 = arith.constant 0 : index
    %32 = vector.load %arg14[%c0_25, %c0_26] : memref<1x128xf32, #tpu.memory_space<vmem>>, vector<1x128xf32>
    %33 = arith.truncf %32 : vector<1x128xf32> to vector<1x128xbf16>
    %c0_27 = arith.constant 0 : index
    %c0_28 = arith.constant 0 : index
    %34 = vector.load %arg11[%c0_27, %c0_28] : memref<128x384xbf16, #tpu.memory_space<vmem>>, vector<128x384xbf16>
    %cst_29 = arith.constant dense<0.000000e+00> : vector<1x384xf32>
    %35 = tpu.matmul %33, %34, %cst_29 {dimension_numbers = #tpu.dot_dimension_numbers<[1], [0], [0], [1], [0, 0, 1, 1], [], []>} : vector<1x128xbf16>, vector<128x384xbf16>, vector<1x384xf32> -> vector<1x384xf32>
    %36 = vector.extract_strided_slice %30 {offsets = [0, 0], sizes = [1, 384], strides = [1, 1]} : vector<8x384xf32> to vector<1x384xf32>
    %37 = vector.extract_strided_slice %36 {offsets = [0, 0], sizes = [1, 128], strides = [1, 1]} : vector<1x384xf32> to vector<1x128xf32>
    %38 = vector.extract_strided_slice %35 {offsets = [0, 0], sizes = [1, 128], strides = [1, 1]} : vector<1x384xf32> to vector<1x128xf32>
    %39 = arith.addf %37, %38 : vector<1x128xf32>
    %40 = arith.negf %39 : vector<1x128xf32>
    %41 = math.exp %40 : vector<1x128xf32>
    %cst_30 = arith.constant 1.000000e+00 : f32
    %42 = vector.broadcast %cst_30 : f32 to vector<1x128xf32>
    %43 = arith.addf %42, %41 : vector<1x128xf32>
    %44 = arith.divf %42, %43 : vector<1x128xf32>
    %45 = vector.extract_strided_slice %36 {offsets = [0, 128], sizes = [1, 128], strides = [1, 1]} : vector<1x384xf32> to vector<1x128xf32>
    %46 = vector.extract_strided_slice %35 {offsets = [0, 128], sizes = [1, 128], strides = [1, 1]} : vector<1x384xf32> to vector<1x128xf32>
    %47 = arith.addf %45, %46 : vector<1x128xf32>
    %48 = arith.negf %47 : vector<1x128xf32>
    %49 = math.exp %48 : vector<1x128xf32>
    %cst_31 = arith.constant 1.000000e+00 : f32
    %50 = vector.broadcast %cst_31 : f32 to vector<1x128xf32>
    %51 = arith.addf %50, %49 : vector<1x128xf32>
    %52 = arith.divf %50, %51 : vector<1x128xf32>
    %53 = vector.extract_strided_slice %36 {offsets = [0, 256], sizes = [1, 128], strides = [1, 1]} : vector<1x384xf32> to vector<1x128xf32>
    %54 = vector.extract_strided_slice %35 {offsets = [0, 256], sizes = [1, 128], strides = [1, 1]} : vector<1x384xf32> to vector<1x128xf32>
    %55 = arith.addf %54, %31 : vector<1x128xf32>
    %56 = arith.mulf %44, %55 : vector<1x128xf32>
    %57 = arith.addf %53, %56 : vector<1x128xf32>
    %58 = math.tanh %57 : vector<1x128xf32>
    %cst_32 = arith.constant 1.000000e+00 : f32
    %59 = vector.broadcast %cst_32 : f32 to vector<1x128xf32>
    %60 = arith.subf %59, %52 : vector<1x128xf32>
    %61 = arith.mulf %60, %58 : vector<1x128xf32>
    %62 = arith.mulf %52, %32 : vector<1x128xf32>
    %63 = arith.addf %61, %62 : vector<1x128xf32>
    %c0_33 = arith.constant 0 : index
    %c0_34 = arith.constant 0 : index
    %64 = vector.load %arg13[%c0_33, %c0_34] : memref<8x128xf32, #tpu.memory_space<vmem>>, vector<1x128xf32>
    tpu.vector_store %arg13[%c0_33, %c0_34], %63 {strides = array<i32>} : memref<8x128xf32, #tpu.memory_space<vmem>>, vector<1x128xf32>,
    %65 = arith.truncf %63 : vector<1x128xf32> to vector<1x128xbf16>
    %c0_35 = arith.constant 0 : index
    %c0_36 = arith.constant 0 : index
    %66 = vector.load %arg11[%c0_35, %c0_36] : memref<128x384xbf16, #tpu.memory_space<vmem>>, vector<128x384xbf16>
    %cst_37 = arith.constant dense<0.000000e+00> : vector<1x384xf32>
    %67 = tpu.matmul %65, %66, %cst_37 {dimension_numbers = #tpu.dot_dimension_numbers<[1], [0], [0], [1], [0, 0, 1, 1], [], []>} : vector<1x128xbf16>, vector<128x384xbf16>, vector<1x384xf32> -> vector<1x384xf32>
    %68 = vector.extract_strided_slice %30 {offsets = [1, 0], sizes = [1, 384], strides = [1, 1]} : vector<8x384xf32> to vector<1x384xf32>
    %69 = vector.extract_strided_slice %68 {offsets = [0, 0], sizes = [1, 128], strides = [1, 1]} : vector<1x384xf32> to vector<1x128xf32>
    %70 = vector.extract_strided_slice %67 {offsets = [0, 0], sizes = [1, 128], strides = [1, 1]} : vector<1x384xf32> to vector<1x128xf32>
    %71 = arith.addf %69, %70 : vector<1x128xf32>
    %72 = arith.negf %71 : vector<1x128xf32>
    %73 = math.exp %72 : vector<1x128xf32>
    %cst_38 = arith.constant 1.000000e+00 : f32
    %74 = vector.broadcast %cst_38 : f32 to vector<1x128xf32>
    %75 = arith.addf %74, %73 : vector<1x128xf32>
    %76 = arith.divf %74, %75 : vector<1x128xf32>
    %77 = vector.extract_strided_slice %68 {offsets = [0, 128], sizes = [1, 128], strides = [1, 1]} : vector<1x384xf32> to vector<1x128xf32>
    %78 = vector.extract_strided_slice %67 {offsets = [0, 128], sizes = [1, 128], strides = [1, 1]} : vector<1x384xf32> to vector<1x128xf32>
    %79 = arith.addf %77, %78 : vector<1x128xf32>
    %80 = arith.negf %79 : vector<1x128xf32>
    %81 = math.exp %80 : vector<1x128xf32>
    %cst_39 = arith.constant 1.000000e+00 : f32
    %82 = vector.broadcast %cst_39 : f32 to vector<1x128xf32>
    %83 = arith.addf %82, %81 : vector<1x128xf32>
    %84 = arith.divf %82, %83 : vector<1x128xf32>
    %85 = vector.extract_strided_slice %68 {offsets = [0, 256], sizes = [1, 128], strides = [1, 1]} : vector<1x384xf32> to vector<1x128xf32>
    %86 = vector.extract_strided_slice %67 {offsets = [0, 256], sizes = [1, 128], strides = [1, 1]} : vector<1x384xf32> to vector<1x128xf32>
    %87 = arith.addf %86, %31 : vector<1x128xf32>
    %88 = arith.mulf %76, %87 : vector<1x128xf32>
    %89 = arith.addf %85, %88 : vector<1x128xf32>
    %90 = math.tanh %89 : vector<1x128xf32>
    %cst_40 = arith.constant 1.000000e+00 : f32
    %91 = vector.broadcast %cst_40 : f32 to vector<1x128xf32>
    %92 = arith.subf %91, %84 : vector<1x128xf32>
    %93 = arith.mulf %92, %90 : vector<1x128xf32>
    %94 = arith.mulf %84, %63 : vector<1x128xf32>
    %95 = arith.addf %93, %94 : vector<1x128xf32>
    %c1 = arith.constant 1 : index
    %c0_41 = arith.constant 0 : index
    %96 = vector.load %arg13[%c1, %c0_41] : memref<8x128xf32, #tpu.memory_space<vmem>>, vector<1x128xf32>
    tpu.vector_store %arg13[%c1, %c0_41], %95 {strides = array<i32>} : memref<8x128xf32, #tpu.memory_space<vmem>>, vector<1x128xf32>,
    %97 = arith.truncf %95 : vector<1x128xf32> to vector<1x128xbf16>
    %c0_42 = arith.constant 0 : index
    %c0_43 = arith.constant 0 : index
    %98 = vector.load %arg11[%c0_42, %c0_43] : memref<128x384xbf16, #tpu.memory_space<vmem>>, vector<128x384xbf16>
    %cst_44 = arith.constant dense<0.000000e+00> : vector<1x384xf32>
    %99 = tpu.matmul %97, %98, %cst_44 {dimension_numbers = #tpu.dot_dimension_numbers<[1], [0], [0], [1], [0, 0, 1, 1], [], []>} : vector<1x128xbf16>, vector<128x384xbf16>, vector<1x384xf32> -> vector<1x384xf32>
    %100 = vector.extract_strided_slice %30 {offsets = [2, 0], sizes = [1, 384], strides = [1, 1]} : vector<8x384xf32> to vector<1x384xf32>
    %101 = vector.extract_strided_slice %100 {offsets = [0, 0], sizes = [1, 128], strides = [1, 1]} : vector<1x384xf32> to vector<1x128xf32>
    %102 = vector.extract_strided_slice %99 {offsets = [0, 0], sizes = [1, 128], strides = [1, 1]} : vector<1x384xf32> to vector<1x128xf32>
    %103 = arith.addf %101, %102 : vector<1x128xf32>
    %104 = arith.negf %103 : vector<1x128xf32>
    %105 = math.exp %104 : vector<1x128xf32>
    %cst_45 = arith.constant 1.000000e+00 : f32
    %106 = vector.broadcast %cst_45 : f32 to vector<1x128xf32>
    %107 = arith.addf %106, %105 : vector<1x128xf32>
    %108 = arith.divf %106, %107 : vector<1x128xf32>
    %109 = vector.extract_strided_slice %100 {offsets = [0, 128], sizes = [1, 128], strides = [1, 1]} : vector<1x384xf32> to vector<1x128xf32>
    %110 = vector.extract_strided_slice %99 {offsets = [0, 128], sizes = [1, 128], strides = [1, 1]} : vector<1x384xf32> to vector<1x128xf32>
    %111 = arith.addf %109, %110 : vector<1x128xf32>
    %112 = arith.negf %111 : vector<1x128xf32>
    %113 = math.exp %112 : vector<1x128xf32>
    %cst_46 = arith.constant 1.000000e+00 : f32
    %114 = vector.broadcast %cst_46 : f32 to vector<1x128xf32>
    %115 = arith.addf %114, %113 : vector<1x128xf32>
    %116 = arith.divf %114, %115 : vector<1x128xf32>
    %117 = vector.extract_strided_slice %100 {offsets = [0, 256], sizes = [1, 128], strides = [1, 1]} : vector<1x384xf32> to vector<1x128xf32>
    %118 = vector.extract_strided_slice %99 {offsets = [0, 256], sizes = [1, 128], strides = [1, 1]} : vector<1x384xf32> to vector<1x128xf32>
    %119 = arith.addf %118, %31 : vector<1x128xf32>
    %120 = arith.mulf %108, %119 : vector<1x128xf32>
    %121 = arith.addf %117, %120 : vector<1x128xf32>
    %122 = math.tanh %121 : vector<1x128xf32>
    %cst_47 = arith.constant 1.000000e+00 : f32
    %123 = vector.broadcast %cst_47 : f32 to vector<1x128xf32>
    %124 = arith.subf %123, %116 : vector<1x128xf32>
    %125 = arith.mulf %124, %122 : vector<1x128xf32>
    %126 = arith.mulf %116, %95 : vector<1x128xf32>
    %127 = arith.addf %125, %126 : vector<1x128xf32>
    %c2 = arith.constant 2 : index
    %c0_48 = arith.constant 0 : index
    %128 = vector.load %arg13[%c2, %c0_48] : memref<8x128xf32, #tpu.memory_space<vmem>>, vector<1x128xf32>
    tpu.vector_store %arg13[%c2, %c0_48], %127 {strides = array<i32>} : memref<8x128xf32, #tpu.memory_space<vmem>>, vector<1x128xf32>,
    %129 = arith.truncf %127 : vector<1x128xf32> to vector<1x128xbf16>
    %c0_49 = arith.constant 0 : index
    %c0_50 = arith.constant 0 : index
    %130 = vector.load %arg11[%c0_49, %c0_50] : memref<128x384xbf16, #tpu.memory_space<vmem>>, vector<128x384xbf16>
    %cst_51 = arith.constant dense<0.000000e+00> : vector<1x384xf32>
    %131 = tpu.matmul %129, %130, %cst_51 {dimension_numbers = #tpu.dot_dimension_numbers<[1], [0], [0], [1], [0, 0, 1, 1], [], []>} : vector<1x128xbf16>, vector<128x384xbf16>, vector<1x384xf32> -> vector<1x384xf32>
    %132 = vector.extract_strided_slice %30 {offsets = [3, 0], sizes = [1, 384], strides = [1, 1]} : vector<8x384xf32> to vector<1x384xf32>
    %133 = vector.extract_strided_slice %132 {offsets = [0, 0], sizes = [1, 128], strides = [1, 1]} : vector<1x384xf32> to vector<1x128xf32>
    %134 = vector.extract_strided_slice %131 {offsets = [0, 0], sizes = [1, 128], strides = [1, 1]} : vector<1x384xf32> to vector<1x128xf32>
    %135 = arith.addf %133, %134 : vector<1x128xf32>
    %136 = arith.negf %135 : vector<1x128xf32>
    %137 = math.exp %136 : vector<1x128xf32>
    %cst_52 = arith.constant 1.000000e+00 : f32
    %138 = vector.broadcast %cst_52 : f32 to vector<1x128xf32>
    %139 = arith.addf %138, %137 : vector<1x128xf32>
    %140 = arith.divf %138, %139 : vector<1x128xf32>
    %141 = vector.extract_strided_slice %132 {offsets = [0, 128], sizes = [1, 128], strides = [1, 1]} : vector<1x384xf32> to vector<1x128xf32>
    %142 = vector.extract_strided_slice %131 {offsets = [0, 128], sizes = [1, 128], strides = [1, 1]} : vector<1x384xf32> to vector<1x128xf32>
    %143 = arith.addf %141, %142 : vector<1x128xf32>
    %144 = arith.negf %143 : vector<1x128xf32>
    %145 = math.exp %144 : vector<1x128xf32>
    %cst_53 = arith.constant 1.000000e+00 : f32
    %146 = vector.broadcast %cst_53 : f32 to vector<1x128xf32>
    %147 = arith.addf %146, %145 : vector<1x128xf32>
    %148 = arith.divf %146, %147 : vector<1x128xf32>
    %149 = vector.extract_strided_slice %132 {offsets = [0, 256], sizes = [1, 128], strides = [1, 1]} : vector<1x384xf32> to vector<1x128xf32>
    %150 = vector.extract_strided_slice %131 {offsets = [0, 256], sizes = [1, 128], strides = [1, 1]} : vector<1x384xf32> to vector<1x128xf32>
    %151 = arith.addf %150, %31 : vector<1x128xf32>
    %152 = arith.mulf %140, %151 : vector<1x128xf32>
    %153 = arith.addf %149, %152 : vector<1x128xf32>
    %154 = math.tanh %153 : vector<1x128xf32>
    %cst_54 = arith.constant 1.000000e+00 : f32
    %155 = vector.broadcast %cst_54 : f32 to vector<1x128xf32>
    %156 = arith.subf %155, %148 : vector<1x128xf32>
    %157 = arith.mulf %156, %154 : vector<1x128xf32>
    %158 = arith.mulf %148, %127 : vector<1x128xf32>
    %159 = arith.addf %157, %158 : vector<1x128xf32>
    %c3 = arith.constant 3 : index
    %c0_55 = arith.constant 0 : index
    %160 = vector.load %arg13[%c3, %c0_55] : memref<8x128xf32, #tpu.memory_space<vmem>>, vector<1x128xf32>
    tpu.vector_store %arg13[%c3, %c0_55], %159 {strides = array<i32>} : memref<8x128xf32, #tpu.memory_space<vmem>>, vector<1x128xf32>,
    %161 = arith.truncf %159 : vector<1x128xf32> to vector<1x128xbf16>
    %c0_56 = arith.constant 0 : index
    %c0_57 = arith.constant 0 : index
    %162 = vector.load %arg11[%c0_56, %c0_57] : memref<128x384xbf16, #tpu.memory_space<vmem>>, vector<128x384xbf16>
    %cst_58 = arith.constant dense<0.000000e+00> : vector<1x384xf32>
    %163 = tpu.matmul %161, %162, %cst_58 {dimension_numbers = #tpu.dot_dimension_numbers<[1], [0], [0], [1], [0, 0, 1, 1], [], []>} : vector<1x128xbf16>, vector<128x384xbf16>, vector<1x384xf32> -> vector<1x384xf32>
    %164 = vector.extract_strided_slice %30 {offsets = [4, 0], sizes = [1, 384], strides = [1, 1]} : vector<8x384xf32> to vector<1x384xf32>
    %165 = vector.extract_strided_slice %164 {offsets = [0, 0], sizes = [1, 128], strides = [1, 1]} : vector<1x384xf32> to vector<1x128xf32>
    %166 = vector.extract_strided_slice %163 {offsets = [0, 0], sizes = [1, 128], strides = [1, 1]} : vector<1x384xf32> to vector<1x128xf32>
    %167 = arith.addf %165, %166 : vector<1x128xf32>
    %168 = arith.negf %167 : vector<1x128xf32>
    %169 = math.exp %168 : vector<1x128xf32>
    %cst_59 = arith.constant 1.000000e+00 : f32
    %170 = vector.broadcast %cst_59 : f32 to vector<1x128xf32>
    %171 = arith.addf %170, %169 : vector<1x128xf32>
    %172 = arith.divf %170, %171 : vector<1x128xf32>
    %173 = vector.extract_strided_slice %164 {offsets = [0, 128], sizes = [1, 128], strides = [1, 1]} : vector<1x384xf32> to vector<1x128xf32>
    %174 = vector.extract_strided_slice %163 {offsets = [0, 128], sizes = [1, 128], strides = [1, 1]} : vector<1x384xf32> to vector<1x128xf32>
    %175 = arith.addf %173, %174 : vector<1x128xf32>
    %176 = arith.negf %175 : vector<1x128xf32>
    %177 = math.exp %176 : vector<1x128xf32>
    %cst_60 = arith.constant 1.000000e+00 : f32
    %178 = vector.broadcast %cst_60 : f32 to vector<1x128xf32>
    %179 = arith.addf %178, %177 : vector<1x128xf32>
    %180 = arith.divf %178, %179 : vector<1x128xf32>
    %181 = vector.extract_strided_slice %164 {offsets = [0, 256], sizes = [1, 128], strides = [1, 1]} : vector<1x384xf32> to vector<1x128xf32>
    %182 = vector.extract_strided_slice %163 {offsets = [0, 256], sizes = [1, 128], strides = [1, 1]} : vector<1x384xf32> to vector<1x128xf32>
    %183 = arith.addf %182, %31 : vector<1x128xf32>
    %184 = arith.mulf %172, %183 : vector<1x128xf32>
    %185 = arith.addf %181, %184 : vector<1x128xf32>
    %186 = math.tanh %185 : vector<1x128xf32>
    %cst_61 = arith.constant 1.000000e+00 : f32
    %187 = vector.broadcast %cst_61 : f32 to vector<1x128xf32>
    %188 = arith.subf %187, %180 : vector<1x128xf32>
    %189 = arith.mulf %188, %186 : vector<1x128xf32>
    %190 = arith.mulf %180, %159 : vector<1x128xf32>
    %191 = arith.addf %189, %190 : vector<1x128xf32>
    %c4 = arith.constant 4 : index
    %c0_62 = arith.constant 0 : index
    %192 = vector.load %arg13[%c4, %c0_62] : memref<8x128xf32, #tpu.memory_space<vmem>>, vector<1x128xf32>
    tpu.vector_store %arg13[%c4, %c0_62], %191 {strides = array<i32>} : memref<8x128xf32, #tpu.memory_space<vmem>>, vector<1x128xf32>,
    %193 = arith.truncf %191 : vector<1x128xf32> to vector<1x128xbf16>
    %c0_63 = arith.constant 0 : index
    %c0_64 = arith.constant 0 : index
    %194 = vector.load %arg11[%c0_63, %c0_64] : memref<128x384xbf16, #tpu.memory_space<vmem>>, vector<128x384xbf16>
    %cst_65 = arith.constant dense<0.000000e+00> : vector<1x384xf32>
    %195 = tpu.matmul %193, %194, %cst_65 {dimension_numbers = #tpu.dot_dimension_numbers<[1], [0], [0], [1], [0, 0, 1, 1], [], []>} : vector<1x128xbf16>, vector<128x384xbf16>, vector<1x384xf32> -> vector<1x384xf32>
    %196 = vector.extract_strided_slice %30 {offsets = [5, 0], sizes = [1, 384], strides = [1, 1]} : vector<8x384xf32> to vector<1x384xf32>
    %197 = vector.extract_strided_slice %196 {offsets = [0, 0], sizes = [1, 128], strides = [1, 1]} : vector<1x384xf32> to vector<1x128xf32>
    %198 = vector.extract_strided_slice %195 {offsets = [0, 0], sizes = [1, 128], strides = [1, 1]} : vector<1x384xf32> to vector<1x128xf32>
    %199 = arith.addf %197, %198 : vector<1x128xf32>
    %200 = arith.negf %199 : vector<1x128xf32>
    %201 = math.exp %200 : vector<1x128xf32>
    %cst_66 = arith.constant 1.000000e+00 : f32
    %202 = vector.broadcast %cst_66 : f32 to vector<1x128xf32>
    %203 = arith.addf %202, %201 : vector<1x128xf32>
    %204 = arith.divf %202, %203 : vector<1x128xf32>
    %205 = vector.extract_strided_slice %196 {offsets = [0, 128], sizes = [1, 128], strides = [1, 1]} : vector<1x384xf32> to vector<1x128xf32>
    %206 = vector.extract_strided_slice %195 {offsets = [0, 128], sizes = [1, 128], strides = [1, 1]} : vector<1x384xf32> to vector<1x128xf32>
    %207 = arith.addf %205, %206 : vector<1x128xf32>
    %208 = arith.negf %207 : vector<1x128xf32>
    %209 = math.exp %208 : vector<1x128xf32>
    %cst_67 = arith.constant 1.000000e+00 : f32
    %210 = vector.broadcast %cst_67 : f32 to vector<1x128xf32>
    %211 = arith.addf %210, %209 : vector<1x128xf32>
    %212 = arith.divf %210, %211 : vector<1x128xf32>
    %213 = vector.extract_strided_slice %196 {offsets = [0, 256], sizes = [1, 128], strides = [1, 1]} : vector<1x384xf32> to vector<1x128xf32>
    %214 = vector.extract_strided_slice %195 {offsets = [0, 256], sizes = [1, 128], strides = [1, 1]} : vector<1x384xf32> to vector<1x128xf32>
    %215 = arith.addf %214, %31 : vector<1x128xf32>
    %216 = arith.mulf %204, %215 : vector<1x128xf32>
    %217 = arith.addf %213, %216 : vector<1x128xf32>
    %218 = math.tanh %217 : vector<1x128xf32>
    %cst_68 = arith.constant 1.000000e+00 : f32
    %219 = vector.broadcast %cst_68 : f32 to vector<1x128xf32>
    %220 = arith.subf %219, %212 : vector<1x128xf32>
    %221 = arith.mulf %220, %218 : vector<1x128xf32>
    %222 = arith.mulf %212, %191 : vector<1x128xf32>
    %223 = arith.addf %221, %222 : vector<1x128xf32>
    %c5 = arith.constant 5 : index
    %c0_69 = arith.constant 0 : index
    %224 = vector.load %arg13[%c5, %c0_69] : memref<8x128xf32, #tpu.memory_space<vmem>>, vector<1x128xf32>
    tpu.vector_store %arg13[%c5, %c0_69], %223 {strides = array<i32>} : memref<8x128xf32, #tpu.memory_space<vmem>>, vector<1x128xf32>,
    %225 = arith.truncf %223 : vector<1x128xf32> to vector<1x128xbf16>
    %c0_70 = arith.constant 0 : index
    %c0_71 = arith.constant 0 : index
    %226 = vector.load %arg11[%c0_70, %c0_71] : memref<128x384xbf16, #tpu.memory_space<vmem>>, vector<128x384xbf16>
    %cst_72 = arith.constant dense<0.000000e+00> : vector<1x384xf32>
    %227 = tpu.matmul %225, %226, %cst_72 {dimension_numbers = #tpu.dot_dimension_numbers<[1], [0], [0], [1], [0, 0, 1, 1], [], []>} : vector<1x128xbf16>, vector<128x384xbf16>, vector<1x384xf32> -> vector<1x384xf32>
    %228 = vector.extract_strided_slice %30 {offsets = [6, 0], sizes = [1, 384], strides = [1, 1]} : vector<8x384xf32> to vector<1x384xf32>
    %229 = vector.extract_strided_slice %228 {offsets = [0, 0], sizes = [1, 128], strides = [1, 1]} : vector<1x384xf32> to vector<1x128xf32>
    %230 = vector.extract_strided_slice %227 {offsets = [0, 0], sizes = [1, 128], strides = [1, 1]} : vector<1x384xf32> to vector<1x128xf32>
    %231 = arith.addf %229, %230 : vector<1x128xf32>
    %232 = arith.negf %231 : vector<1x128xf32>
    %233 = math.exp %232 : vector<1x128xf32>
    %cst_73 = arith.constant 1.000000e+00 : f32
    %234 = vector.broadcast %cst_73 : f32 to vector<1x128xf32>
    %235 = arith.addf %234, %233 : vector<1x128xf32>
    %236 = arith.divf %234, %235 : vector<1x128xf32>
    %237 = vector.extract_strided_slice %228 {offsets = [0, 128], sizes = [1, 128], strides = [1, 1]} : vector<1x384xf32> to vector<1x128xf32>
    %238 = vector.extract_strided_slice %227 {offsets = [0, 128], sizes = [1, 128], strides = [1, 1]} : vector<1x384xf32> to vector<1x128xf32>
    %239 = arith.addf %237, %238 : vector<1x128xf32>
    %240 = arith.negf %239 : vector<1x128xf32>
    %241 = math.exp %240 : vector<1x128xf32>
    %cst_74 = arith.constant 1.000000e+00 : f32
    %242 = vector.broadcast %cst_74 : f32 to vector<1x128xf32>
    %243 = arith.addf %242, %241 : vector<1x128xf32>
    %244 = arith.divf %242, %243 : vector<1x128xf32>
    %245 = vector.extract_strided_slice %228 {offsets = [0, 256], sizes = [1, 128], strides = [1, 1]} : vector<1x384xf32> to vector<1x128xf32>
    %246 = vector.extract_strided_slice %227 {offsets = [0, 256], sizes = [1, 128], strides = [1, 1]} : vector<1x384xf32> to vector<1x128xf32>
    %247 = arith.addf %246, %31 : vector<1x128xf32>
    %248 = arith.mulf %236, %247 : vector<1x128xf32>
    %249 = arith.addf %245, %248 : vector<1x128xf32>
    %250 = math.tanh %249 : vector<1x128xf32>
    %cst_75 = arith.constant 1.000000e+00 : f32
    %251 = vector.broadcast %cst_75 : f32 to vector<1x128xf32>
    %252 = arith.subf %251, %244 : vector<1x128xf32>
    %253 = arith.mulf %252, %250 : vector<1x128xf32>
    %254 = arith.mulf %244, %223 : vector<1x128xf32>
    %255 = arith.addf %253, %254 : vector<1x128xf32>
    %c6 = arith.constant 6 : index
    %c0_76 = arith.constant 0 : index
    %256 = vector.load %arg13[%c6, %c0_76] : memref<8x128xf32, #tpu.memory_space<vmem>>, vector<1x128xf32>
    tpu.vector_store %arg13[%c6, %c0_76], %255 {strides = array<i32>} : memref<8x128xf32, #tpu.memory_space<vmem>>, vector<1x128xf32>,
    %257 = arith.truncf %255 : vector<1x128xf32> to vector<1x128xbf16>
    %c0_77 = arith.constant 0 : index
    %c0_78 = arith.constant 0 : index
    %258 = vector.load %arg11[%c0_77, %c0_78] : memref<128x384xbf16, #tpu.memory_space<vmem>>, vector<128x384xbf16>
    %cst_79 = arith.constant dense<0.000000e+00> : vector<1x384xf32>
    %259 = tpu.matmul %257, %258, %cst_79 {dimension_numbers = #tpu.dot_dimension_numbers<[1], [0], [0], [1], [0, 0, 1, 1], [], []>} : vector<1x128xbf16>, vector<128x384xbf16>, vector<1x384xf32> -> vector<1x384xf32>
    %260 = vector.extract_strided_slice %30 {offsets = [7, 0], sizes = [1, 384], strides = [1, 1]} : vector<8x384xf32> to vector<1x384xf32>
    %261 = vector.extract_strided_slice %260 {offsets = [0, 0], sizes = [1, 128], strides = [1, 1]} : vector<1x384xf32> to vector<1x128xf32>
    %262 = vector.extract_strided_slice %259 {offsets = [0, 0], sizes = [1, 128], strides = [1, 1]} : vector<1x384xf32> to vector<1x128xf32>
    %263 = arith.addf %261, %262 : vector<1x128xf32>
    %264 = arith.negf %263 : vector<1x128xf32>
    %265 = math.exp %264 : vector<1x128xf32>
    %cst_80 = arith.constant 1.000000e+00 : f32
    %266 = vector.broadcast %cst_80 : f32 to vector<1x128xf32>
    %267 = arith.addf %266, %265 : vector<1x128xf32>
    %268 = arith.divf %266, %267 : vector<1x128xf32>
    %269 = vector.extract_strided_slice %260 {offsets = [0, 128], sizes = [1, 128], strides = [1, 1]} : vector<1x384xf32> to vector<1x128xf32>
    %270 = vector.extract_strided_slice %259 {offsets = [0, 128], sizes = [1, 128], strides = [1, 1]} : vector<1x384xf32> to vector<1x128xf32>
    %271 = arith.addf %269, %270 : vector<1x128xf32>
    %272 = arith.negf %271 : vector<1x128xf32>
    %273 = math.exp %272 : vector<1x128xf32>
    %cst_81 = arith.constant 1.000000e+00 : f32
    %274 = vector.broadcast %cst_81 : f32 to vector<1x128xf32>
    %275 = arith.addf %274, %273 : vector<1x128xf32>
    %276 = arith.divf %274, %275 : vector<1x128xf32>
    %277 = vector.extract_strided_slice %260 {offsets = [0, 256], sizes = [1, 128], strides = [1, 1]} : vector<1x384xf32> to vector<1x128xf32>
    %278 = vector.extract_strided_slice %259 {offsets = [0, 256], sizes = [1, 128], strides = [1, 1]} : vector<1x384xf32> to vector<1x128xf32>
    %279 = arith.addf %278, %31 : vector<1x128xf32>
    %280 = arith.mulf %268, %279 : vector<1x128xf32>
    %281 = arith.addf %277, %280 : vector<1x128xf32>
    %282 = math.tanh %281 : vector<1x128xf32>
    %cst_82 = arith.constant 1.000000e+00 : f32
    %283 = vector.broadcast %cst_82 : f32 to vector<1x128xf32>
    %284 = arith.subf %283, %276 : vector<1x128xf32>
    %285 = arith.mulf %284, %282 : vector<1x128xf32>
    %286 = arith.mulf %276, %255 : vector<1x128xf32>
    %287 = arith.addf %285, %286 : vector<1x128xf32>
    %c7 = arith.constant 7 : index
    %c0_83 = arith.constant 0 : index
    %288 = vector.load %arg13[%c7, %c0_83] : memref<8x128xf32, #tpu.memory_space<vmem>>, vector<1x128xf32>
    tpu.vector_store %arg13[%c7, %c0_83], %287 {strides = array<i32>} : memref<8x128xf32, #tpu.memory_space<vmem>>, vector<1x128xf32>,
    %c0_84 = arith.constant 0 : index
    %c0_85 = arith.constant 0 : index
    %289 = vector.load %arg14[%c0_84, %c0_85] : memref<1x128xf32, #tpu.memory_space<vmem>>, vector<1x128xf32>
    tpu.vector_store %arg14[%c0_84, %c0_85], %287 {strides = array<i32>} : memref<1x128xf32, #tpu.memory_space<vmem>>, vector<1x128xf32>,
    return
  }
  func.func @transform_0(%arg0: i32) -> (i32, i32) {
    %c0_i32 = arith.constant 0 : i32
    %c0_i32_0 = arith.constant 0 : i32
    return %arg0, %c0_i32 : i32, i32
  }
  func.func @transform_1(%arg0: i32) -> (i32, i32) {
    %c0_i32 = arith.constant 0 : i32
    %c0_i32_0 = arith.constant 0 : i32
    return %arg0, %c0_i32 : i32, i32
  }
  func.func @transform_2(%arg0: i32) -> (i32, i32) {
    %c0_i32 = arith.constant 0 : i32
    %c0_i32_0 = arith.constant 0 : i32
    %c0_i32_1 = arith.constant 0 : i32
    return %c0_i32, %c0_i32_0 : i32, i32
  }
  func.func @transform_3(%arg0: i32) -> (i32, i32) {
    %c0_i32 = arith.constant 0 : i32
    %c0_i32_0 = arith.constant 0 : i32
    %c0_i32_1 = arith.constant 0 : i32
    return %c0_i32, %c0_i32_0 : i32, i32
  }
  func.func @transform_4(%arg0: i32) -> (i32, i32) {
    %c0_i32 = arith.constant 0 : i32
    %c0_i32_0 = arith.constant 0 : i32
    %c0_i32_1 = arith.constant 0 : i32
    return %c0_i32, %c0_i32_0 : i32, i32
  }
  func.func @transform_5(%arg0: i32) -> (i32, i32) {
    %c0_i32 = arith.constant 0 : i32
    %c0_i32_0 = arith.constant 0 : i32
    %c0_i32_1 = arith.constant 0 : i32
    return %c0_i32, %c0_i32_0 : i32, i32
  }
  func.func @transform_6(%arg0: i32) -> (i32, i32) {
    %c0_i32 = arith.constant 0 : i32
    %c0_i32_0 = arith.constant 0 : i32
    %c0_i32_1 = arith.constant 0 : i32
    return %c0_i32, %c0_i32_0 : i32, i32
  }
  func.func @transform_7(%arg0: i32) -> (i32, i32) {
    %c0_i32 = arith.constant 0 : i32
    %c0_i32_0 = arith.constant 0 : i32
    %c0_i32_1 = arith.constant 0 : i32
    return %c0_i32, %c0_i32_0 : i32, i32
  }
  func.func @transform_8(%arg0: i32) -> (i32, i32) {
    %c0_i32 = arith.constant 0 : i32
    %c0_i32_0 = arith.constant 0 : i32
    %c0_i32_1 = arith.constant 0 : i32
    return %c0_i32, %c0_i32_0 : i32, i32
  }
  func.func @transform_9(%arg0: i32) -> (i32, i32) {
    %c0_i32 = arith.constant 0 : i32
    %c0_i32_0 = arith.constant 0 : i32
    %c0_i32_1 = arith.constant 0 : i32
    return %c0_i32, %c0_i32_0 : i32, i32
  }
  func.func @transform_10(%arg0: i32) -> (i32, i32) {
    %c0_i32 = arith.constant 0 : i32
    %c0_i32_0 = arith.constant 0 : i32
    %c0_i32_1 = arith.constant 0 : i32
    return %c0_i32, %c0_i32_0 : i32, i32
  }
  func.func @transform_11(%arg0: i32) -> (i32, i32) {
    %c0_i32 = arith.constant 0 : i32
    %c0_i32_0 = arith.constant 0 : i32
    %c0_i32_1 = arith.constant 0 : i32
    return %c0_i32, %c0_i32_0 : i32, i32
  }
  func.func @transform_12(%arg0: i32) -> (i32, i32) {
    %c0_i32 = arith.constant 0 : i32
    %c0_i32_0 = arith.constant 0 : i32
    return %arg0, %c0_i32 : i32, i32
  }
}

</mosaic_0001>

<bundles_post_ra>
// kernel: tpu_custom_call.1
= control target key start
LH: loop header
LB: loop body
LE: loop exit
PB: predicated region body
PF: predicated region fallthrough
CT: control target
= control target key end

     0   :  { %17 = vsyncpa [#allocation4], 0  ;;  %s4739_s0 = inlined_call_operand.hbm [shape: f32[8,128], index: 0, kind: input, shape index: {}]   ;;  %s4740_s1 = inlined_call_operand.hbm [shape: f32[8,128], index: 1, kind: input, shape index: {}]   ;;  %s4741_s2 = inlined_call_operand.vmem [shape: f32[1,128], index: 2, kind: input, shape index: {}]   ;;  %s4742_s3 = inlined_call_operand.hbm [shape: bf16[128,128], index: 3, kind: input, shape index: {}]   ;;  %s4743_s4 = inlined_call_operand.vmem [shape: f32[1,128], index: 4, kind: input, shape index: {}]   ;;  %s4744_s5 = inlined_call_operand.hbm [shape: bf16[128,128], index: 5, kind: input, shape index: {}]   ;;  %s4745_s6 = inlined_call_operand.vmem [shape: f32[1,128], index: 6, kind: input, shape index: {}]   ;;  %s4746_s7 = inlined_call_operand.hbm [shape: bf16[128,384], index: 7, kind: input, shape index: {}]   ;;  %s4747_s8 = inlined_call_operand.hbm [shape: bf16[128,384], index: 8, kind: input, shape index: {}]   ;;  %s4748_s9 = inlined_call_operand.vmem [shape: f32[1,384], index: 9, kind: input, shape index: {}]   ;;  %s4749_s10 = inlined_call_operand.hbm [shape: bf16[128,384], index: 10, kind: input, shape index: {}]   ;;  %s4750_s11 = inlined_call_operand.vmem [shape: f32[1,128], index: 11, kind: input, shape index: {}]   ;;  %s4751_s12 = inlined_call_operand.hbm [shape: f32[8,128], index: 12, kind: output, shape index: {}]  }
   0x1   :  { %18 = vsyncpa [#allocation7], 0 }
   0x2   :  { %19 = vsyncpa [#allocation10], 0 }
   0x3   :  { %20 = vsyncpa [#allocation13], 0 }
   0x4   :  { %21 = vsyncpa [#allocation5], 0  ;;  %s4200_s21 = smov [#allocation6]  }
   0x5   :  { %s38_s22 = sshll.u32 %s4200_s21, 4  ;;  %s39_s22 = int_to_ptr.vmem [resolvable:$true] %s38_s22 }
   0x6   :  { %s4038_s23 = scalar_lea.vmem %s39_s22, 128  ;;  %p4043_p1 = scmp.lt.s32.totalorder %s39_s22, %s39_s22 }
   0x7   :  { %p4039_p0 = scmp.ne.s32.totalorder %s39_s22, %s4038_s23  ;;  %p4044_p2 = scmp.lt.s32.totalorder %s4038_s23, %s4038_s23 }
   0x9   :  { %p4045_p3 = por %p4044_p2, %p4043_p1 }
   0xb   :  { %p4046_p4 = pnand %p4045_p3, %p4039_p0 }
   0xd   :  { %4049 = shalt.err (!%p4046_p4)
}
   0xe   :  { %41 = dma.hbm_to_vmem [thread:$0]  %s4740_s1, 128, %s39_s22, [#allocation7]  }
   0xf   :  { %s4201_s26 = smov [#allocation9]  }
  0x10   :  { %s63_s27 = sshll.u32 %s4201_s26, 4  ;;  %s64_s27 = int_to_ptr.vmem [resolvable:$true] %s63_s27 }
  0x11   :  { %s4058_s28 = scalar_lea.vmem %s64_s27, 1024  ;;  %p4063_p6 = scmp.lt.s32.totalorder %s64_s27, %s64_s27 }
  0x12   :  { %p4059_p5 = scmp.ne.s32.totalorder %s64_s27, %s4058_s28  ;;  %p4064_p7 = scmp.lt.s32.totalorder %s4058_s28, %s4058_s28 }
  0x14   :  { %p4065_p8 = por %p4064_p7, %p4063_p6 }
  0x16   :  { %p4066_p9 = pnand %p4065_p8, %p4059_p5 }
  0x18   :  { %4069 = shalt.err (!%p4066_p9)
}
  0x19   :  { %s4202_s29 = smov 64   ;;  %s4203_s30 = smov 4  }
  0x1a   :  { %69 = dma.hbm_to_vmem [thread:$0]  %s4744_s5, 1024, %s64_s27, [#allocation10], %s4202_s29, %s4202_s29, %s4203_s30  }
  0x1b   :  { %s4204_s1 = smov [#allocation12]   ;;  %s4205_s16 = smov [#allocation3]  }
  0x1c   :  { %s89_s15 = sshll.u32 %s4204_s1, 4  ;;  %s28_s17 = sshll.u32 %s4205_s16, 4  ;;  %s90_s15 = int_to_ptr.vmem [resolvable:$true] %s89_s15  ;;  %s29_s17 = int_to_ptr.vmem [resolvable:$true] %s28_s17 }
  0x1d   :  { %s4078_s18 = scalar_lea.vmem %s90_s15, 3072  ;;  %p4083_p11 = scmp.lt.s32.totalorder %s90_s15, %s90_s15 }
  0x1e   :  { %p4079_p10 = scmp.ne.s32.totalorder %s90_s15, %s4078_s18  ;;  %p4084_p12 = scmp.lt.s32.totalorder %s4078_s18, %s4078_s18 }
  0x20   :  { %p4085_p13 = por %p4084_p12, %p4083_p11 }
  0x22   :  { %p4086_p0 = pnand %p4085_p13, %p4079_p10 }
  0x24   :  { %4089 = shalt.err (!%p4086_p0)
}
  0x25   :  { %s4206_s19 = smov 192   ;;  %s4207_s20 = smov 12  }
  0x26   :  { %95 = dma.hbm_to_vmem [thread:$0]  %s4747_s8, 3072, %s90_s15, [#allocation13], %s4206_s19, %s4206_s19, %s4207_s20  }
  0x27   :  { %s4098_s22 = scalar_lea.vmem %s29_s17, 128  ;;  %p4103_p2 = scmp.lt.s32.totalorder %s29_s17, %s29_s17 }
  0x28   :  { %p4099_p1 = scmp.ne.s32.totalorder %s29_s17, %s4098_s22  ;;  %p4104_p3 = scmp.lt.s32.totalorder %s4098_s22, %s4098_s22 }
  0x2a   :  { %p4105_p4 = por %p4104_p3, %p4103_p2 }
  0x2c   :  { %p4106_p5 = pnand %p4105_p4, %p4099_p1 }
  0x2e   :  { %4109 = shalt.err (!%p4106_p5)
}
  0x2f   :  { %31 = dma.hbm_to_vmem [thread:$0]  %s4739_s0, 128, %s29_s17, [#allocation4]  }
  0x30   :  { %s4208_s25 = smov [#allocation8]   ;;  %s4209_s27 = smov [#allocation11]  }
  0x31   :  { %s49_s26 = sshll.u32 %s4208_s25, 4  ;;  %s77_s28 = sshll.u32 %s4209_s27, 4  ;;  %s50_s26 = int_to_ptr.vmem [resolvable:$true] %s49_s26  ;;  %s78_s28 = int_to_ptr.vmem [resolvable:$true] %s77_s28 }
  0x32   :  { %s4118_s13 = scalar_lea.vmem %s50_s26, 1024  ;;  %p4123_p7 = scmp.lt.s32.totalorder %s50_s26, %s50_s26 }
  0x33   :  { %p4119_p6 = scmp.ne.s32.totalorder %s50_s26, %s4118_s13  ;;  %p4124_p8 = scmp.lt.s32.totalorder %s4118_s13, %s4118_s13 }
  0x35   :  { %p4125_p9 = por %p4124_p8, %p4123_p7 }
  0x37   :  { %p4126_p10 = pnand %p4125_p9, %p4119_p6 }
  0x39   :  { %4129 = shalt.err (!%p4126_p10)
}
  0x3a   :  { %55 = dma.hbm_to_vmem [thread:$0]  %s4742_s3, 1024, %s50_s26, [#allocation7], %s4202_s29, %s4202_s29, %s4203_s30  }
  0x3b   :  { %s4138_s0 = scalar_lea.vmem %s78_s28, 3072  ;;  %p4143_p12 = scmp.lt.s32.totalorder %s78_s28, %s78_s28 }
  0x3c   :  { %p4139_p11 = scmp.ne.s32.totalorder %s78_s28, %s4138_s0  ;;  %p4144_p13 = scmp.lt.s32.totalorder %s4138_s0, %s4138_s0 }
  0x3e   :  { %p4145_p0 = por %p4144_p13, %p4143_p12 }
  0x40   :  { %p4146_p1 = pnand %p4145_p0, %p4139_p11 }
  0x42   :  { %4149 = shalt.err (!%p4146_p1)
}
  0x43   :  { %83 = dma.hbm_to_vmem [thread:$0]  %s4746_s7, 3072, %s78_s28, [#allocation10], %s4206_s19, %s4206_s19, %s4207_s20  }
  0x44   :  { %s4210_s16 = smov [#allocation14]  }
  0x45   :  { %s103_s17 = sshll.u32 %s4210_s16, 4  ;;  %s104_s17 = int_to_ptr.vmem [resolvable:$true] %s103_s17 }
  0x46   :  { %s4158_s18 = scalar_lea.vmem %s104_s17, 3072  ;;  %p4163_p3 = scmp.lt.s32.totalorder %s104_s17, %s104_s17 }
  0x47   :  { %p4159_p2 = scmp.ne.s32.totalorder %s104_s17, %s4158_s18  ;;  %p4164_p4 = scmp.lt.s32.totalorder %s4158_s18, %s4158_s18 }
  0x49   :  { %p4165_p5 = por %p4164_p4, %p4163_p3 }
  0x4b   :  { %p4166_p6 = pnand %p4165_p5, %p4159_p2 }
  0x4d   :  { %4169 = shalt.err (!%p4166_p6)
}
  0x4e   :  { %109 = dma.hbm_to_vmem [thread:$0]  %s4749_s10, 3072, %s104_s17, [#allocation13], %s4206_s19, %s4206_s19, %s4207_s20  }
  0x4f   :  { %4190 = dma.done.wait [#allocation4], 128  }
  0x50   :  { %4191 = vsyncadd [#allocation4], 4294967168 }
  0x51   :  { %4192 = dma.done.wait [#allocation7], 1152  }
  0x52   :  { %4193 = vsyncadd [#allocation7], 4294966144 }
  0x53   :  { %4194 = dma.done.wait [#allocation10], 4096  }
  0x54   :  { %4195 = vsyncadd [#allocation10], 4294963200 }
  0x55   :  { %4196 = dma.done.wait [#allocation13], 6144  }
  0x56   :  { %4197 = vsyncadd [#allocation13], 4294961152  ;;  %v4211_v0 = vmov 0.0   ;;  %vm4212_vm0 = vmmov 0   ;;  %v3757_v1 = vld [vmem:[#allocation9 + $0x38] sm:$0xff]   ;;  %v3758_v2 = vld [vmem:[#allocation9 + $0x30] sm:$0xff]  }
  0x57   :  { %3522 = vmatprep.subr.bf16.mxu1 %v4211_v0  ;;  %3502 = vmatprep.subr.bf16.mxu0 %v4211_v0  ;;  %v3759_v3 = vld [vmem:[#allocation9 + $0x28] sm:$0xff]   ;;  %v3764_v4 = vld [vmem:[#allocation8 + $0x38] sm:$0xff]   ;;  %v3766_v5 = vld [vmem:[#allocation8 + $0x30] sm:$0xff]   ;;  %v4213_v46 = vmov 0   ;;  %s4214_s23 = smov [#allocation15]  }
  0x58   :  { %3538 = vmatprep.mubr.msk.bf16.mxu1 %vm4212_vm0, %v4211_v0  ;;  %3518 = vmatprep.mubr.msk.bf16.mxu0 %vm4212_vm0, %v4211_v0  ;;  %v3760_v6 = vld [vmem:[#allocation9 + $0x20] sm:$0xff]   ;;  %v3767_v7 = vld [vmem:[#allocation8 + $0x28] sm:$0xff]   ;;  %v3761_v8 = vld [vmem:[#allocation9 + $0x18] sm:$0xff]   ;;  %s3108_s24 = sshll.u32 %s4214_s23, 4  ;;  %s3109_s24 = int_to_ptr.vmem [resolvable:$true] %s3108_s24 }
  0x59   :  { %3523 = vmatpush3.bf16.msra.mxu1 %v3757_v1  ;;  %3503 = vmatpush3.bf16.msra.mxu0 %v3764_v4  ;;  %v3768_v9 = vld [vmem:[#allocation8 + $0x20] sm:$0xff]   ;;  %v3762_v10 = vld [vmem:[#allocation9 + $0x10] sm:$0xff]   ;;  %v3769_v11 = vld [vmem:[#allocation8 + $0x18] sm:$0xff]   ;;  %p4175_p8 = scmp.lt.s32.totalorder %s3109_s24, %s3109_s24 }
  0x5a   :  { %3524 = vmatprep.subr.bf16.mxu1 %v4211_v0  ;;  %3504 = vmatprep.subr.bf16.mxu0 %v4211_v0  ;;  %v3763_v12 = vld [vmem:[#allocation9 + $0x8] sm:$0xff]   ;;  %v3765_v13 = vld [vmem:[#allocation9] sm:$0xff]   ;;  %v3770_v14 = vld [vmem:[#allocation8 + $0x10] sm:$0xff]  }
  0x5b   :  { %v254_v15 = vld [vmem:[#allocation6] sm:$0xff]  ;;  %v3771_v17 = vld [vmem:[#allocation8 + $0x8] sm:$0xff]   ;;  %v3772_v19 = vld [vmem:[#allocation8] sm:$0xff]  }
  0x5c   :  { %v255_v16 = vpack.c.bf16 %v254_v15, %v254_v15  ;;  %v3776_v18 = vld [vmem:[#allocation12 + $0xb0] ss:$12 sps:$4 sm:$0xff]   ;;  %v3775_v21 = vld [vmem:[#allocation12 + $0xac] ss:$12 sps:$4 sm:$0xff]   ;;  %v3773_v23 = vld [vmem:[#allocation12 + $0xa8] ss:$12 sps:$4 sm:$0xff]  }
  0x5d   :  { %3525 = vmatpush3.bf16.msra.mxu1 %v3758_v2  ;;  %3505 = vmatpush3.bf16.msra.mxu0 %v3766_v5  ;;  %v140_v20 = vld [vmem:[#allocation3] sm:$0xff]  ;;  %v3780_v22 = vld [vmem:[#allocation12 + $0x98] ss:$12 sps:$4 sm:$0xff]   ;;  %v3784_v26 = vld [vmem:[#allocation12 + $0x80] ss:$12 sps:$4 sm:$0xff]  }
  0x5e   :  { %3526 = vmatprep.subr.bf16.mxu1 %v4211_v0  ;;  %3506 = vmatprep.subr.bf16.mxu0 %v4211_v0  ;;  %v141_v24 = vpack.c.bf16 %v140_v20, %v140_v20  ;;  %v3779_v25 = vld [vmem:[#allocation12 + $0x94] ss:$12 sps:$4 sm:$0xff]   ;;  %v3777_v27 = vld [vmem:[#allocation12 + $0x90] ss:$12 sps:$4 sm:$0xff]   ;;  %v3781_v30 = vld [vmem:[#allocation12 + $0x78] ss:$12 sps:$4 sm:$0xff]  }
  0x5f   :  { %v3783_v28 = vld [vmem:[#allocation12 + $0x7c] ss:$12 sps:$4 sm:$0xff]   ;;  %v3787_v31 = vld [vmem:[#allocation12 + $0x64] ss:$12 sps:$4 sm:$0xff]   ;;  %v3785_v33 = vld [vmem:[#allocation12 + $0x60] ss:$12 sps:$4 sm:$0xff]  }
  0x60   :  { %v3788_v29 = vld [vmem:[#allocation12 + $0x68] ss:$12 sps:$4 sm:$0xff]   ;;  %v3792_v32 = vld [vmem:[#allocation12 + $0x50] ss:$12 sps:$4 sm:$0xff]   ;;  %v3791_v34 = vld [vmem:[#allocation12 + $0x4c] ss:$12 sps:$4 sm:$0xff]  }
  0x61   :  { %3527 = vmatpush3.bf16.msra.mxu1 %v3759_v3  ;;  %3507 = vmatpush3.bf16.msra.mxu0 %v3767_v7  ;;  %v3796_v35 = vld [vmem:[#allocation12 + $0x38] ss:$12 sps:$4 sm:$0xff]   ;;  %v3789_v36 = vld [vmem:[#allocation12 + $0x48] ss:$12 sps:$4 sm:$0xff]   ;;  %v3800_v38 = vld [vmem:[#allocation12 + $0x20] ss:$12 sps:$4 sm:$0xff]  }
  0x62   :  { %3528 = vmatprep.subr.bf16.mxu1 %v4211_v0  ;;  %3508 = vmatprep.subr.bf16.mxu0 %v4211_v0  ;;  %v3795_v37 = vld [vmem:[#allocation12 + $0x34] ss:$12 sps:$4 sm:$0xff]   ;;  %v3793_v39 = vld [vmem:[#allocation12 + $0x30] ss:$12 sps:$4 sm:$0xff]   ;;  %v3797_v41 = vld [vmem:[#allocation12 + $0x18] ss:$12 sps:$4 sm:$0xff]  }
  0x63   :  { %v3799_v40 = vld [vmem:[#allocation12 + $0x1c] ss:$12 sps:$4 sm:$0xff]   ;;  %v3803_v42 = vld [vmem:[#allocation12 + $0x4] ss:$12 sps:$4 sm:$0xff]   ;;  %v3801_v43 = vld [vmem:[#allocation12] ss:$12 sps:$4 sm:$0xff]  }
  0x64   :  { %v3804_v44 = vld [vmem:[#allocation12 + $0x8] ss:$12 sps:$4 sm:$0xff]   ;;  %v3807_v45 = vld [vmem:[#allocation11 + $0xac] ss:$12 sps:$4 sm:$0xff]   ;;  %v3808_v55 = vld [vmem:[#allocation11 + $0xb0] ss:$12 sps:$4 sm:$0xff]  }
  0x65   :  { %3529 = vmatpush3.bf16.msra.mxu1 %v3760_v6  ;;  %3509 = vmatpush3.bf16.msra.mxu0 %v3768_v9  ;;  %v138_v47 = vld [vmem:[%s4741_s2] sm:$0x1]  ;;  %v3805_v54 = vld [vmem:[#allocation11 + $0xa8] ss:$12 sps:$4 sm:$0xff]   ;;  %v3809_v60 = vld [vmem:[#allocation11 + $0x90] ss:$12 sps:$4 sm:$0xff]  }
  0x66   :  { %3530 = vmatprep.subr.bf16.mxu1 %v4211_v0  ;;  %3510 = vmatprep.subr.bf16.mxu0 %v4211_v0  ;;  %139 = vst [vmem:[#allocation2] sm:$0x1] %v138_v47  ;;  %v3129_v48 = vld [vmem:[%s4745_s6] ss:$0 sm:$0xff]  ;;  %v3811_v57 = vld [vmem:[#allocation11 + $0x94] ss:$12 sps:$4 sm:$0xff]  }
  0x67   :  { %v3812_v61 = vld [vmem:[#allocation11 + $0x98] ss:$12 sps:$4 sm:$0xff]   ;;  %v3815_v62 = vld [vmem:[#allocation11 + $0x7c] ss:$12 sps:$4 sm:$0xff]   ;;  %v3816_v3 = vld [vmem:[#allocation11 + $0x80] ss:$12 sps:$4 sm:$0xff]  }
  0x68   :  { %v3813_v2 = vld [vmem:[#allocation11 + $0x78] ss:$12 sps:$4 sm:$0xff]   ;;  %v3817_v6 = vld [vmem:[#allocation11 + $0x60] ss:$12 sps:$4 sm:$0xff]   ;;  %v3820_v7 = vld [vmem:[#allocation11 + $0x68] ss:$12 sps:$4 sm:$0xff]  }
  0x69   :  { %3531 = vmatpush3.bf16.msra.mxu1 %v3761_v8  ;;  %3511 = vmatpush3.bf16.msra.mxu0 %v3769_v11  ;;  %v3819_v4 = vld [vmem:[#allocation11 + $0x64] ss:$12 sps:$4 sm:$0xff]   ;;  %v3823_v8 = vld [vmem:[#allocation11 + $0x4c] ss:$12 sps:$4 sm:$0xff]   ;;  %v3821_v9 = vld [vmem:[#allocation11 + $0x48] ss:$12 sps:$4 sm:$0xff]  }
  0x6a   :  { %3532 = vmatprep.subr.bf16.mxu1 %v4211_v0  ;;  %3512 = vmatprep.subr.bf16.mxu0 %v4211_v0  ;;  %v3827_v11 = vld [vmem:[#allocation11 + $0x34] ss:$12 sps:$4 sm:$0xff]   ;;  %v3831_v15 = vld [vmem:[#allocation11 + $0x1c] ss:$12 sps:$4 sm:$0xff]  }
  0x6b   :  { %v4421_v47 = vld [vmem:[#allocation14] ss:$12 sps:$4 sm:$0xff]  }
  0x6d   :  { %3533 = vmatpush3.bf16.msra.mxu1 %v3762_v10  ;;  %3513 = vmatpush3.bf16.msra.mxu0 %v3770_v14  ;;  %v3824_v10 = vld [vmem:[#allocation11 + $0x50] ss:$12 sps:$4 sm:$0xff]   ;;  %v3828_v14 = vld [vmem:[#allocation11 + $0x38] ss:$12 sps:$4 sm:$0xff]  }
  0x6e   :  { %3534 = vmatprep.subr.bf16.mxu1 %v4211_v0  ;;  %3514 = vmatprep.subr.bf16.mxu0 %v4211_v0 }
  0x71   :  { %3535 = vmatpush3.bf16.msra.mxu1 %v3763_v12  ;;  %3515 = vmatpush3.bf16.msra.mxu0 %v3771_v17  ;;  %v3120_v12 = vld [vmem:[%s4743_s4] ss:$0 sm:$0xff]  ;;  %v3829_v17 = vld [vmem:[#allocation11 + $0x18] ss:$12 sps:$4 sm:$0xff]  }
  0x72   :  { %3536 = vmatprep.subr.bf16.mxu1 %v4211_v0  ;;  %3516 = vmatprep.subr.bf16.mxu0 %v4211_v0 }
  0x75   :  { %3537 = vmatpush3.bf16.msra.mxu1 %v3765_v13  ;;  %3517 = vmatpush3.bf16.msra.mxu0 %v3772_v19  ;;  %v3825_v13 = vld [vmem:[#allocation11 + $0x30] ss:$12 sps:$4 sm:$0xff]  }
  0x76   :  { %3542 = vmatprep.subr.bf16.mxu1 %v4211_v0  ;;  %562 = vmatprep.subr.bf16.mxu0 %v3775_v21  ;;  %v3835_v19 = vld [vmem:[#allocation11 + $0x4] ss:$12 sps:$4 sm:$0xff]   ;;  %v3833_v21 = vld [vmem:[#allocation11] ss:$12 sps:$4 sm:$0xff]  }
  0x78   :  { %3539 = vmatmul.mubr.bf16.vlgmr.msra.gmra.mxu1 %v255_v16  ;;  %3519 = vmatmul.mubr.bf16.vlgmr.msra.gmra.mxu0 %v141_v24 }
  0x79   :  { %3543 = vmatpush3.bf16.msra.mxu1 %v3776_v18  ;;  %3558 = vmatprep.mubr.msk.bf16.mxu1 %vm4212_vm0, %v4211_v0  ;;  %v3832_v18 = vld [vmem:[#allocation11 + $0x20] ss:$12 sps:$4 sm:$0xff]  }
  0x7a   :  { %3544 = vmatprep.subr.bf16.mxu1 %v4211_v0  ;;  %563 = vmatpush1.bf16.msra.mxu0 %v3773_v23  ;;  %v4367_v23 = vld [vmem:[#allocation14 + $0xac] ss:$12 sps:$4 sm:$0xff]  }
  0x7b   :  { %564 = vmatprep.subr.bf16.mxu0 %v3779_v25  ;;  %594 = vmatprep.mubr.bf16.mxu0 %v4213_v46  ;;  %v4369_v25 = vld [vmem:[#allocation14 + $0xa8] ss:$12 sps:$4 sm:$0xff]  }
  0x7d   :  { %3545 = vmatpush3.bf16.msra.mxu1 %v3780_v22  ;;  %v3836_v22 = vld [vmem:[#allocation11 + $0x8] ss:$12 sps:$4 sm:$0xff]  }
  0x7e   :  { %3546 = vmatprep.subr.bf16.mxu1 %v4211_v0  ;;  %565 = vmatpush1.bf16.msra.mxu0 %v3777_v27  ;;  %v4372_v27 = vld [vmem:[#allocation14 + $0x94] ss:$12 sps:$4 sm:$0xff]  }
  0x7f   :  { %566 = vmatprep.subr.bf16.mxu0 %v3783_v28  ;;  %v4376_v28 = vld [vmem:[#allocation14 + $0x90] ss:$12 sps:$4 sm:$0xff]  }
  0x81   :  { %3547 = vmatpush3.bf16.msra.mxu1 %v3784_v26  ;;  %v3858_v26 = vld [vmem:[#allocation14 + $0xb0] ss:$12 sps:$4 sm:$0xff]  }
  0x82   :  { %3548 = vmatprep.subr.bf16.mxu1 %v4211_v0  ;;  %567 = vmatpush1.bf16.msra.mxu0 %v3781_v30  ;;  %v4379_v30 = vld [vmem:[#allocation14 + $0x7c] ss:$12 sps:$4 sm:$0xff]  }
  0x83   :  { %568 = vmatprep.subr.bf16.mxu0 %v3787_v31  ;;  %v4386_v31 = vld [vmem:[#allocation14 + $0x78] ss:$12 sps:$4 sm:$0xff]  }
  0x85   :  { %3549 = vmatpush3.bf16.msra.mxu1 %v3788_v29  ;;  %v3862_v29 = vld [vmem:[#allocation14 + $0x98] ss:$12 sps:$4 sm:$0xff]  }
  0x86   :  { %3550 = vmatprep.subr.bf16.mxu1 %v4211_v0  ;;  %569 = vmatpush1.bf16.msra.mxu0 %v3785_v33  ;;  %v4389_v33 = vld [vmem:[#allocation14 + $0x64] ss:$12 sps:$4 sm:$0xff]  }
  0x87   :  { %570 = vmatprep.subr.bf16.mxu0 %v3791_v34  ;;  %v4393_v34 = vld [vmem:[#allocation14 + $0x60] ss:$12 sps:$4 sm:$0xff]  }
  0x89   :  { %3551 = vmatpush3.bf16.msra.mxu1 %v3792_v32  ;;  %v3863_v32 = vld [vmem:[#allocation14 + $0x80] ss:$12 sps:$4 sm:$0xff]  }
  0x8a   :  { %3552 = vmatprep.subr.bf16.mxu1 %v4211_v0  ;;  %571 = vmatpush1.bf16.msra.mxu0 %v3789_v36  ;;  %v4396_v36 = vld [vmem:[#allocation14 + $0x4c] ss:$12 sps:$4 sm:$0xff]  }
  0x8b   :  { %572 = vmatprep.subr.bf16.mxu0 %v3795_v37  ;;  %v4400_v37 = vld [vmem:[#allocation14 + $0x48] ss:$12 sps:$4 sm:$0xff]  }
  0x8d   :  { %3553 = vmatpush3.bf16.msra.mxu1 %v3796_v35  ;;  %v3864_v35 = vld [vmem:[#allocation14 + $0x68] ss:$12 sps:$4 sm:$0xff]  }
  0x8e   :  { %3554 = vmatprep.subr.bf16.mxu1 %v4211_v0  ;;  %573 = vmatpush1.bf16.msra.mxu0 %v3793_v39  ;;  %v4403_v39 = vld [vmem:[#allocation14 + $0x34] ss:$12 sps:$4 sm:$0xff]  }
  0x8f   :  { %574 = vmatprep.subr.bf16.mxu0 %v3799_v40  ;;  %v4407_v40 = vld [vmem:[#allocation14 + $0x30] ss:$12 sps:$4 sm:$0xff]  }
  0x91   :  { %3555 = vmatpush3.bf16.msra.mxu1 %v3800_v38  ;;  %v3865_v38 = vld [vmem:[#allocation14 + $0x50] ss:$12 sps:$4 sm:$0xff]  }
  0x92   :  { %3556 = vmatprep.subr.bf16.mxu1 %v4211_v0  ;;  %575 = vmatpush1.bf16.msra.mxu0 %v3797_v41  ;;  %v3866_v41 = vld [vmem:[#allocation14 + $0x38] ss:$12 sps:$4 sm:$0xff]  }
  0x93   :  { %576 = vmatprep.subr.bf16.mxu0 %v3803_v42  ;;  %v4410_v42 = vld [vmem:[#allocation14 + $0x1c] ss:$12 sps:$4 sm:$0xff]  }
  0x95   :  { %3557 = vmatpush3.bf16.msra.mxu1 %v3804_v44  ;;  %v3867_v44 = vld [vmem:[#allocation14 + $0x20] ss:$12 sps:$4 sm:$0xff]  }
  0x96   :  { %577 = vmatpush1.bf16.msra.mxu0 %v3801_v43  ;;  %3562 = vmatprep.subr.bf16.mxu1 %v4211_v0  ;;  %v4414_v43 = vld [vmem:[#allocation14 + $0x18] ss:$12 sps:$4 sm:$0xff]  }
  0x97   :  { %771 = vmatprep.subr.bf16.mxu0 %v3807_v45  ;;  %v4417_v45 = vld [vmem:[#allocation14 + $0x4] ss:$12 sps:$4 sm:$0xff]  }
 0x138   :  { %v361_v49 = vpop.f32.mrf.mxu1  ;;  %v247_v59 = vpop.f32.mrf.mxu0 }
 0x139   :  { %v362_v50 = vadd.f32 %v3129_v48, %v361_v49  ;;  %v248_v16 = vadd.f32 %v3120_v12, %v247_v59  ;;  %v4423_v48 = vld [vmem:[#allocation2] sm:$0x1]  ;;  %v3868_v49 = vld [vmem:[#allocation14 + $0x8] ss:$12 sps:$4 sm:$0xff]  }
 0x13a   :  { %v3540_v51 = vpop.f32.mrf.mxu1  ;;  %v3520_v63 = vpop.f32.mrf.mxu0 }
 0x13b   :  { %v367_v52 = vmax.f32 %v362_v50, 0.0  ;;  %v253_v20 = vmax.f32 %v248_v16, 0.0  ;;  %v874_v50 = vpack.c.bf16 %v4423_v48, %v4423_v48  ;;  %v3869_v51 = vld [vmem:[#allocation14 + $0xb0] ss:$12 sps:$4 sm:$0xff]  }
 0x13c   :  { %v364_v53 = vpop.f32.mrf.mxu1  ;;  %v250_v1 = vpop.f32.mrf.mxu0  ;;  %v852_v16 = vld [vmem:[%s4748_s9] sm:$0x7] }
 0x13d   :  { %v401_v56 = vpack.c.bf16 %v367_v52, %v367_v52  ;;  %v368_v24 = vpack.c.bf16 %v253_v20, %v253_v20  ;;  %v3870_v52 = vld [vmem:[#allocation14 + $0x98] ss:$12 sps:$4 sm:$0xff]   ;;  %v3871_v53 = vld [vmem:[#allocation14 + $0x80] ss:$12 sps:$4 sm:$0xff]  }
 0x13e   :  { %v3541_v58 = vpop.f32.mrf.mxu1  ;;  %v3521_v5 = vpop.f32.mrf.mxu0 }
 0x13f   :  { %595 = vmatmul.mubr.bf16.vlgmr.msra.gmra.mxu0 %v401_v56  ;;  %3559 = vmatmul.mubr.bf16.vlgmr.msra.gmra.mxu1 %v401_v56  ;;  %v3874_v56 = vld [vmem:[#allocation14 + $0x38] ss:$12 sps:$4 sm:$0xff]   ;;  %v3876_v58 = vld [vmem:[#allocation14 + $0x8] ss:$12 sps:$4 sm:$0xff]  }
 0x140   :  { %772 = vmatpush1.bf16.msra.mxu0 %v3805_v54  ;;  %3563 = vmatpush3.bf16.msra.mxu1 %v3808_v55  ;;  %v3872_v54 = vld [vmem:[#allocation14 + $0x68] ss:$12 sps:$4 sm:$0xff]   ;;  %v3873_v55 = vld [vmem:[#allocation14 + $0x50] ss:$12 sps:$4 sm:$0xff]  }
 0x141   :  { %773 = vmatprep.subr.bf16.mxu0 %v3811_v57  ;;  %3564 = vmatprep.subr.bf16.mxu1 %v4211_v0  ;;  %v3875_v57 = vld [vmem:[#allocation14 + $0x20] ss:$12 sps:$4 sm:$0xff]  }
 0x142   :  { %803 = vmatprep.mubr.bf16.mxu0 %v4213_v46  ;;  %3578 = vmatprep.mubr.msk.bf16.mxu1 %vm4212_vm0, %v4211_v0 }
 0x144   :  { %774 = vmatpush1.bf16.msra.mxu0 %v3809_v60  ;;  %3565 = vmatpush3.bf16.msra.mxu1 %v3812_v61 }
 0x145   :  { %775 = vmatprep.subr.bf16.mxu0 %v3815_v62  ;;  %3566 = vmatprep.subr.bf16.mxu1 %v4211_v0 }
 0x148   :  { %776 = vmatpush1.bf16.msra.mxu0 %v3813_v2  ;;  %3567 = vmatpush3.bf16.msra.mxu1 %v3816_v3 }
 0x149   :  { %777 = vmatprep.subr.bf16.mxu0 %v3819_v4  ;;  %3568 = vmatprep.subr.bf16.mxu1 %v4211_v0 }
 0x14c   :  { %778 = vmatpush1.bf16.msra.mxu0 %v3817_v6  ;;  %3569 = vmatpush3.bf16.msra.mxu1 %v3820_v7 }
 0x14d   :  { %779 = vmatprep.subr.bf16.mxu0 %v3823_v8  ;;  %3570 = vmatprep.subr.bf16.mxu1 %v4211_v0 }
 0x150   :  { %780 = vmatpush1.bf16.msra.mxu0 %v3821_v9  ;;  %3571 = vmatpush3.bf16.msra.mxu1 %v3824_v10 }
 0x151   :  { %781 = vmatprep.subr.bf16.mxu0 %v3827_v11  ;;  %3572 = vmatprep.subr.bf16.mxu1 %v4211_v0 }
 0x154   :  { %782 = vmatpush1.bf16.msra.mxu0 %v3825_v13  ;;  %3573 = vmatpush3.bf16.msra.mxu1 %v3828_v14  ;;  %v854_v13 = vlaneseq }
 0x155   :  { %783 = vmatprep.subr.bf16.mxu0 %v3831_v15  ;;  %3574 = vmatprep.subr.bf16.mxu1 %v4211_v0 }
 0x156   :  { %v855_v14 = vshrl.u32 %v854_v13, 7  ;;  %v3881_v13 = vld [vmem:[#allocation14 + $0x50] ss:$12 sps:$4 sm:$0xff]  }
 0x158   :  { %784 = vmatpush1.bf16.msra.mxu0 %v3829_v17  ;;  %3575 = vmatpush3.bf16.msra.mxu1 %v3832_v18  ;;  %v856_v15 = vsub.s32 0, %v855_v14 }
 0x159   :  { %785 = vmatprep.subr.bf16.mxu0 %v3835_v19  ;;  %3576 = vmatprep.subr.bf16.mxu1 %v4211_v0  ;;  %v860_v19 = vsub.s32 1, %v855_v14 }
 0x15a   :  { %v857_v18 = vrot.slane %v852_v16, %v856_v15  ;;  %v3884_v15 = vld [vmem:[#allocation14 + $0x8] ss:$12 sps:$4 sm:$0xff]  }
 0x15c   :  { %786 = vmatpush1.bf16.msra.mxu0 %v3833_v21  ;;  %3577 = vmatpush3.bf16.msra.mxu1 %v3836_v22 }
 0x15d   :  { %1035 = vmatprep.subr.bf16.mxu0 %v4367_v23  ;;  %3582 = vmatprep.subr.bf16.mxu1 %v4211_v0 }
 0x15f   :  { %804 = vmatmul.mubr.bf16.vlgmr.msra.gmra.mxu0 %v368_v24  ;;  %3579 = vmatmul.mubr.bf16.vlgmr.msra.gmra.mxu1 %v368_v24 }
 0x160   :  { %1036 = vmatpush1.bf16.msra.mxu0 %v4369_v25  ;;  %3583 = vmatpush3.bf16.msra.mxu1 %v3858_v26  ;;  %v861_v26 = vrot.slane %v852_v16, %v860_v19 }
 0x161   :  { %1037 = vmatprep.subr.bf16.mxu0 %v4372_v27  ;;  %3584 = vmatprep.subr.bf16.mxu1 %v4211_v0 }
 0x162   :  { %1067 = vmatprep.mubr.bf16.mxu0 %v4213_v46  ;;  %3598 = vmatprep.mubr.msk.bf16.mxu1 %vm4212_vm0, %v4211_v0 }
 0x164   :  { %1038 = vmatpush1.bf16.msra.mxu0 %v4376_v28  ;;  %3585 = vmatpush3.bf16.msra.mxu1 %v3862_v29 }
 0x165   :  { %1039 = vmatprep.subr.bf16.mxu0 %v4379_v30  ;;  %3586 = vmatprep.subr.bf16.mxu1 %v4211_v0 }
 0x168   :  { %1040 = vmatpush1.bf16.msra.mxu0 %v4386_v31  ;;  %3587 = vmatpush3.bf16.msra.mxu1 %v3863_v32 }
 0x169   :  { %1041 = vmatprep.subr.bf16.mxu0 %v4389_v33  ;;  %3588 = vmatprep.subr.bf16.mxu1 %v4211_v0 }
 0x16c   :  { %1042 = vmatpush1.bf16.msra.mxu0 %v4393_v34  ;;  %3589 = vmatpush3.bf16.msra.mxu1 %v3864_v35 }
 0x16d   :  { %1043 = vmatprep.subr.bf16.mxu0 %v4396_v36  ;;  %3590 = vmatprep.subr.bf16.mxu1 %v4211_v0 }
 0x170   :  { %1044 = vmatpush1.bf16.msra.mxu0 %v4400_v37  ;;  %3591 = vmatpush3.bf16.msra.mxu1 %v3865_v38 }
 0x171   :  { %1045 = vmatprep.subr.bf16.mxu0 %v4403_v39  ;;  %3592 = vmatprep.subr.bf16.mxu1 %v4211_v0 }
 0x174   :  { %1046 = vmatpush1.bf16.msra.mxu0 %v4407_v40  ;;  %3593 = vmatpush3.bf16.msra.mxu1 %v3866_v41 }
 0x175   :  { %1047 = vmatprep.subr.bf16.mxu0 %v4410_v42  ;;  %3594 = vmatprep.subr.bf16.mxu1 %v4211_v0 }
 0x178   :  { %1048 = vmatpush1.bf16.msra.mxu0 %v4414_v43  ;;  %3595 = vmatpush3.bf16.msra.mxu1 %v3867_v44 }
 0x179   :  { %1049 = vmatprep.subr.bf16.mxu0 %v4417_v45  ;;  %3596 = vmatprep.subr.bf16.mxu1 %v4211_v0 }
 0x17c   :  { %1050 = vmatpush1.bf16.msra.mxu0 %v4421_v47  ;;  %3597 = vmatpush3.bf16.msra.mxu1 %v3868_v49 }
 0x17d   :  { %1300 = vmatprep.subr.bf16.mxu0 %v4367_v23  ;;  %3602 = vmatprep.subr.bf16.mxu1 %v4211_v0 }
 0x17f   :  { %1068 = vmatmul.mubr.bf16.vlgmr.msra.gmra.mxu0 %v874_v50  ;;  %3599 = vmatmul.mubr.bf16.vlgmr.msra.gmra.mxu1 %v874_v50 }
 0x180   :  { %1301 = vmatpush1.bf16.msra.mxu0 %v4369_v25  ;;  %1332 = vmatprep.mubr.bf16.mxu0 %v4213_v46 }
 0x181   :  { %1302 = vmatprep.subr.bf16.mxu0 %v4372_v27  ;;  %3618 = vmatprep.mubr.msk.bf16.mxu1 %vm4212_vm0, %v4211_v0 }
 0x182   :  { %3603 = vmatpush3.bf16.msra.mxu1 %v3869_v51 }
 0x183   :  { %3604 = vmatprep.subr.bf16.mxu1 %v4211_v0 }
 0x184   :  { %1303 = vmatpush1.bf16.msra.mxu0 %v4376_v28 }
 0x185   :  { %1304 = vmatprep.subr.bf16.mxu0 %v4379_v30 }
 0x186   :  { %3605 = vmatpush3.bf16.msra.mxu1 %v3870_v52 }
 0x187   :  { %3606 = vmatprep.subr.bf16.mxu1 %v4211_v0 }
 0x188   :  { %1305 = vmatpush1.bf16.msra.mxu0 %v4386_v31 }
 0x189   :  { %1306 = vmatprep.subr.bf16.mxu0 %v4389_v33 }
 0x18a   :  { %3607 = vmatpush3.bf16.msra.mxu1 %v3871_v53 }
 0x18b   :  { %3608 = vmatprep.subr.bf16.mxu1 %v4211_v0 }
 0x18c   :  { %1307 = vmatpush1.bf16.msra.mxu0 %v4393_v34 }
 0x18d   :  { %1308 = vmatprep.subr.bf16.mxu0 %v4396_v36 }
 0x18e   :  { %3609 = vmatpush3.bf16.msra.mxu1 %v3872_v54 }
 0x18f   :  { %3610 = vmatprep.subr.bf16.mxu1 %v4211_v0 }
 0x190   :  { %1309 = vmatpush1.bf16.msra.mxu0 %v4400_v37 }
 0x191   :  { %1310 = vmatprep.subr.bf16.mxu0 %v4403_v39 }
 0x192   :  { %3611 = vmatpush3.bf16.msra.mxu1 %v3873_v55 }
 0x193   :  { %3612 = vmatprep.subr.bf16.mxu1 %v4211_v0 }
 0x194   :  { %1311 = vmatpush1.bf16.msra.mxu0 %v4407_v40 }
 0x195   :  { %1312 = vmatprep.subr.bf16.mxu0 %v4410_v42 }
 0x196   :  { %3613 = vmatpush3.bf16.msra.mxu1 %v3874_v56  ;;  %v864_v56 = vsub.s32 2, %v855_v14  ;;  %v3882_v14 = vld [vmem:[#allocation14 + $0x38] ss:$12 sps:$4 sm:$0xff]  }
 0x197   :  { %3614 = vmatprep.subr.bf16.mxu1 %v4211_v0 }
 0x198   :  { %1313 = vmatpush1.bf16.msra.mxu0 %v4414_v43 }
 0x199   :  { %1314 = vmatprep.subr.bf16.mxu0 %v4417_v45 }
 0x19a   :  { %3615 = vmatpush3.bf16.msra.mxu1 %v3875_v57 }
 0x19b   :  { %3616 = vmatprep.subr.bf16.mxu1 %v4211_v0 }
 0x19c   :  { %1315 = vmatpush1.bf16.msra.mxu0 %v4421_v47 }
 0x19d   :  { %1581 = vmatprep.subr.bf16.mxu0 %v4367_v23 }
 0x19e   :  { %3617 = vmatpush3.bf16.msra.mxu1 %v3876_v58  ;;  %v4471_v58 = vld [vmem:[%s4750_s11] sm:$0x1] }
 0x19f   :  { %3622 = vmatprep.subr.bf16.mxu1 %v4211_v0 }
 0x1ff   :  { %v596_v59 = vpop.f32.mrf.mxu0  ;;  %v637_v60 = vpop.f32.mrf.mxu1 }
 0x201   :  { %v598_v61 = vpop.f32.mrf.mxu0  ;;  %v3560_v62 = vpop.f32.mrf.mxu1 }
 0x203   :  { %v600_v63 = vpop.f32.mrf.mxu0  ;;  %v640_v1 = vpop.f32.mrf.mxu1 }
 0x205   :  { %v601_v2 = vpop.f32.mrf.mxu0  ;;  %v3561_v3 = vpop.f32.mrf.mxu1 }
 0x21f   :  { %v805_v4 = vpop.f32.mrf.mxu0  ;;  %v846_v5 = vpop.f32.mrf.mxu1 }
 0x220   :  { %v847_v6 = vadd.f32 %v846_v5, %v637_v60  ;;  %v806_v17 = vadd.f32 %v805_v4, %v596_v59  ;;  %v865_v59 = vrot.slane %v852_v16, %v864_v56 }
 0x221   :  { %v807_v7 = vpop.f32.mrf.mxu0  ;;  %v3580_v8 = vpop.f32.mrf.mxu1 }
 0x222   :  { %v4462_v20 = vadd.f32 %v857_v18, %v806_v17  ;;  %v808_v24 = vadd.f32 %v807_v7, %v598_v61  ;;  %v4474_v63 = vadd.f32 %v865_v59, %v847_v6  ;;  %v3878_v6 = vld [vmem:[#allocation14 + $0x98] ss:$12 sps:$4 sm:$0xff]  }
 0x223   :  { %v809_v9 = vpop.f32.mrf.mxu0  ;;  %v849_v10 = vpop.f32.mrf.mxu1 }
 0x224   :  { %v4465_v49 = vadd.f32 %v861_v26, %v808_v24 }
 0x225   :  { %v810_v11 = vpop.f32.mrf.mxu0  ;;  %v3581_v12 = vpop.f32.mrf.mxu1 }
 0x226   :  { %v3879_v11 = vld [vmem:[#allocation14 + $0x80] ss:$12 sps:$4 sm:$0xff]   ;;  %v3880_v12 = vld [vmem:[#allocation14 + $0x68] ss:$12 sps:$4 sm:$0xff]  }
 0x23f   :  { %v1069_v21 = vpop.f32.mrf.mxu0  ;;  %v1110_v22 = vpop.f32.mrf.mxu1 }
 0x240   :  { %v1116_v29 = vadd.f32 %v1069_v21, %v4462_v20  ;;  %v1130_v61 = vadd.f32 %v1110_v22, %v4471_v58 }
 0x241   :  { %v1071_v32 = vpop.f32.mrf.mxu0  ;;  %v3600_v35 = vpop.f32.mrf.mxu1 }
 0x242   :  { %v3210_v38 = vmul.f32 -1.442695, %v1116_v29  ;;  %v1123_v52 = vadd.f32 %v1071_v32, %v4465_v49 }
 0x243   :  { %v1073_v41 = vpop.f32.mrf.mxu0  ;;  %v1113_v44 = vpop.f32.mrf.mxu1 }
 0x244   :  { %3949 = vpow2.f32 %v3210_v38  ;;  %v3211_v53 = vmul.f32 -1.442695, %v1123_v52 }
 0x245   :  { %v1074_v50 = vpop.f32.mrf.mxu0  ;;  %v3601_v51 = vpop.f32.mrf.mxu1 }
 0x246   :  { %3951 = vpow2.f32 %v3211_v53 }
 0x251   :  { %v3950_v54 = vpop.eup %3949 }
 0x252   :  { %v1120_v55 = vadd.f32 1.0, %v3950_v54 }
 0x253   :  { %v3952_v57 = vpop.eup %3951 }
 0x254   :  { %3953 = vrcp.f32 %v1120_v55  ;;  %v1127_v60 = vadd.f32 1.0, %v3952_v57 }
 0x256   :  { %3955 = vrcp.f32 %v1127_v60 }
 0x261   :  { %v3954_v62 = vpop.eup %3953 }
 0x262   :  { %v1131_v1 = vmul.f32 %v3954_v62, %v1130_v61 }
 0x263   :  { %v3956_v3 = vpop.eup %3955 }
 0x264   :  { %v1132_v2 = vadd.f32 %v1131_v1, %v4474_v63  ;;  %v1134_v4 = vsub.f32 1.0, %v3956_v3  ;;  %v1136_v8 = vmul.f32 %v3956_v3, %v4423_v48  ;;  %v3877_v48 = vld [vmem:[#allocation14 + $0xb0] ss:$12 sps:$4 sm:$0xff]  }
 0x266   :  { %3957 = vtanh.f32 %v1132_v2 }
 0x273   :  { %v3958_v5 = vpop.eup %3957 }
 0x274   :  { %v1135_v7 = vmul.f32 %v3958_v5, %v1134_v4 }
 0x276   :  { %v4478_v9 = vadd.f32 %v1136_v8, %v1135_v7 }
 0x278   :  { %1138 = vst [vmem:[#allocation15] sm:$0x1] %v4478_v9  ;;  %v1139_v10 = vpack.c.bf16 %v4478_v9, %v4478_v9  ;;  %v1411_v62 = vrot.slane %v4478_v9, 7 }
 0x27a   :  { %1333 = vmatmul.mubr.bf16.vlgmr.msra.gmra.mxu0 %v1139_v10  ;;  %3619 = vmatmul.mubr.bf16.vlgmr.msra.gmra.mxu1 %v1139_v10 }
 0x27b   :  { %1582 = vmatpush1.bf16.msra.mxu0 %v4369_v25  ;;  %1613 = vmatprep.mubr.bf16.mxu0 %v4213_v46 }
 0x27c   :  { %1583 = vmatprep.subr.bf16.mxu0 %v4372_v27  ;;  %3638 = vmatprep.mubr.msk.bf16.mxu1 %vm4212_vm0, %v4211_v0 }
 0x27d   :  { %3623 = vmatpush3.bf16.msra.mxu1 %v3877_v48 }
 0x27e   :  { %3624 = vmatprep.subr.bf16.mxu1 %v4211_v0 }
 0x27f   :  { %1584 = vmatpush1.bf16.msra.mxu0 %v4376_v28 }
 0x280   :  { %1585 = vmatprep.subr.bf16.mxu0 %v4379_v30 }
 0x281   :  { %3625 = vmatpush3.bf16.msra.mxu1 %v3878_v6 }
 0x282   :  { %3626 = vmatprep.subr.bf16.mxu1 %v4211_v0 }
 0x283   :  { %1586 = vmatpush1.bf16.msra.mxu0 %v4386_v31 }
 0x284   :  { %1587 = vmatprep.subr.bf16.mxu0 %v4389_v33 }
 0x285   :  { %3627 = vmatpush3.bf16.msra.mxu1 %v3879_v11 }
 0x286   :  { %3628 = vmatprep.subr.bf16.mxu1 %v4211_v0 }
 0x287   :  { %1588 = vmatpush1.bf16.msra.mxu0 %v4393_v34 }
 0x288   :  { %1589 = vmatprep.subr.bf16.mxu0 %v4396_v36 }
 0x289   :  { %3629 = vmatpush3.bf16.msra.mxu1 %v3880_v12 }
 0x28a   :  { %3630 = vmatprep.subr.bf16.mxu1 %v4211_v0 }
 0x28b   :  { %1590 = vmatpush1.bf16.msra.mxu0 %v4400_v37 }
 0x28c   :  { %1591 = vmatprep.subr.bf16.mxu0 %v4403_v39 }
 0x28d   :  { %3631 = vmatpush3.bf16.msra.mxu1 %v3881_v13 }
 0x28e   :  { %3632 = vmatprep.subr.bf16.mxu1 %v4211_v0 }
 0x28f   :  { %1592 = vmatpush1.bf16.msra.mxu0 %v4407_v40 }
 0x290   :  { %1593 = vmatprep.subr.bf16.mxu0 %v4410_v42 }
 0x291   :  { %3633 = vmatpush3.bf16.msra.mxu1 %v3882_v14 }
 0x292   :  { %3634 = vmatprep.subr.bf16.mxu1 %v4211_v0 }
 0x293   :  { %1594 = vmatpush1.bf16.msra.mxu0 %v4414_v43 }
 0x294   :  { %1595 = vmatprep.subr.bf16.mxu0 %v4417_v45 }
 0x297   :  { %1596 = vmatpush1.bf16.msra.mxu0 %v4421_v47 }
 0x298   :  { %1861 = vmatprep.subr.bf16.mxu0 %v4367_v23  ;;  %v3883_v23 = vld [vmem:[#allocation14 + $0x20] ss:$12 sps:$4 sm:$0xff]  }
 0x299   :  { %3635 = vmatpush3.bf16.msra.mxu1 %v3883_v23 }
 0x29a   :  { %3636 = vmatprep.subr.bf16.mxu1 %v4211_v0 }
 0x29d   :  { %3637 = vmatpush3.bf16.msra.mxu1 %v3884_v15 }
 0x29e   :  { %3642 = vmatprep.subr.bf16.mxu1 %v4211_v0 }
 0x33a   :  { %v1334_v16 = vpop.f32.mrf.mxu0  ;;  %v1375_v17 = vpop.f32.mrf.mxu1 }
 0x33b   :  { %v1382_v18 = vrot.slane %v1334_v16, 7  ;;  %v1401_v53 = vadd.f32 %v1375_v17, %v4471_v58 }
 0x33c   :  { %v1336_v19 = vpop.f32.mrf.mxu0  ;;  %v3620_v21 = vpop.f32.mrf.mxu1 }
 0x33d   :  { %v1384_v22 = vadd.f32 %v1382_v18, %v4462_v20  ;;  %v1392_v32 = vrot.slane %v1336_v19, 7  ;;  %v1403_v55 = vrot.slane %v1401_v53, 7  ;;  %v4565_v53 = vld [vmem:[#allocation14 + $0x94] ss:$12 sps:$4 sm:$0xff]  }
 0x33e   :  { %v1338_v24 = vpop.f32.mrf.mxu0  ;;  %v1378_v26 = vpop.f32.mrf.mxu1 }
 0x33f   :  { %v3236_v29 = vmul.f32 -1.442695, %v1384_v22  ;;  %v1394_v41 = vadd.f32 %v1392_v32, %v4465_v49 }
 0x340   :  { %v1339_v35 = vpop.f32.mrf.mxu0  ;;  %v3621_v38 = vpop.f32.mrf.mxu1 }
 0x341   :  { %3959 = vpow2.f32 %v3236_v29  ;;  %v3237_v44 = vmul.f32 -1.442695, %v1394_v41 }
 0x343   :  { %3961 = vpow2.f32 %v3237_v44 }
 0x34e   :  { %v3960_v50 = vpop.eup %3959 }
 0x34f   :  { %v1388_v51 = vadd.f32 1.0, %v3960_v50  ;;  %v4559_v50 = vld [vmem:[#allocation14 + $0xac] ss:$12 sps:$4 sm:$0xff]  }
 0x350   :  { %v3962_v52 = vpop.eup %3961 }
 0x351   :  { %3963 = vrcp.f32 %v1388_v51  ;;  %v1398_v54 = vadd.f32 1.0, %v3962_v52  ;;  %v4561_v51 = vld [vmem:[#allocation14 + $0xa8] ss:$12 sps:$4 sm:$0xff]   ;;  %v3896_v52 = vld [vmem:[#allocation14 + $0xb0] ss:$12 sps:$4 sm:$0xff]  }
 0x353   :  { %3965 = vrcp.f32 %v1398_v54  ;;  %v4568_v54 = vld [vmem:[#allocation14 + $0x90] ss:$12 sps:$4 sm:$0xff]  }
 0x35e   :  { %v3964_v56 = vpop.eup %3963 }
 0x35f   :  { %v1405_v57 = vmul.f32 %v3964_v56, %v1403_v55  ;;  %v3900_v55 = vld [vmem:[#allocation14 + $0x98] ss:$12 sps:$4 sm:$0xff]   ;;  %v4572_v56 = vld [vmem:[#allocation14 + $0x7c] ss:$12 sps:$4 sm:$0xff]  }
 0x360   :  { %v3966_v60 = vpop.eup %3965 }
 0x361   :  { %v1406_v59 = vadd.f32 %v1405_v57, %v4474_v63  ;;  %v1408_v61 = vsub.f32 1.0, %v3966_v60  ;;  %v1413_v3 = vmul.f32 %v3966_v60, %v1411_v62  ;;  %v4575_v57 = vld [vmem:[#allocation14 + $0x78] ss:$12 sps:$4 sm:$0xff]   ;;  %v3908_v62 = vld [vmem:[#allocation14 + $0x68] ss:$12 sps:$4 sm:$0xff]  }
 0x362   :  { %v4578_v60 = vld [vmem:[#allocation14 + $0x64] ss:$12 sps:$4 sm:$0xff]  }
 0x363   :  { %3967 = vtanh.f32 %v1406_v59  ;;  %v3904_v59 = vld [vmem:[#allocation14 + $0x80] ss:$12 sps:$4 sm:$0xff]  }
 0x370   :  { %v3968_v1 = vpop.eup %3967 }
 0x371   :  { %v1409_v2 = vmul.f32 %v3968_v1, %v1408_v61  ;;  %v4581_v61 = vld [vmem:[#allocation14 + $0x60] ss:$12 sps:$4 sm:$0xff]  }
 0x372   :  { %v4585_v1 = vld [vmem:[#allocation14 + $0x4c] ss:$12 sps:$4 sm:$0xff]  }
 0x373   :  { %v4515_v4 = vadd.f32 %v1413_v3, %v1409_v2  ;;  %v4588_v2 = vld [vmem:[#allocation14 + $0x48] ss:$12 sps:$4 sm:$0xff]   ;;  %v3912_v3 = vld [vmem:[#allocation14 + $0x50] ss:$12 sps:$4 sm:$0xff]  }
 0x375   :  { %1415 = vst [vmem:[#allocation15] sm:$0x2] %v4515_v4  ;;  %v1416_v5 = vpack.c.bf16 %v4515_v4, %v4515_v4  ;;  %v1692_v26 = vrot.slane %v4515_v4, 7  ;;  %v4592_v4 = vld [vmem:[#allocation14 + $0x34] ss:$12 sps:$4 sm:$0xff]  }
 0x377   :  { %v1450_v7 = vshrl.u32 %v1416_v5, 16  ;;  %v4595_v5 = vld [vmem:[#allocation14 + $0x30] ss:$12 sps:$4 sm:$0xff]  }
 0x379   :  { %1614 = vmatmul.mubr.bf16.vlgmr.msra.gmra.mxu0 %v1450_v7  ;;  %3639 = vmatmul.mubr.bf16.vlgmr.msra.gmra.mxu1 %v1450_v7  ;;  %v3916_v7 = vld [vmem:[#allocation14 + $0x38] ss:$12 sps:$4 sm:$0xff]  }
 0x37a   :  { %1862 = vmatpush1.bf16.msra.mxu0 %v4369_v25  ;;  %1893 = vmatprep.mubr.bf16.mxu0 %v4213_v46  ;;  %v3885_v25 = vld [vmem:[#allocation14 + $0xb0] ss:$12 sps:$4 sm:$0xff]  }
 0x37b   :  { %1863 = vmatprep.subr.bf16.mxu0 %v4372_v27  ;;  %3658 = vmatprep.mubr.msk.bf16.mxu1 %vm4212_vm0, %v4211_v0  ;;  %v3886_v27 = vld [vmem:[#allocation14 + $0x98] ss:$12 sps:$4 sm:$0xff]  }
 0x37c   :  { %3643 = vmatpush3.bf16.msra.mxu1 %v3885_v25  ;;  %v4599_v25 = vld [vmem:[#allocation14 + $0x1c] ss:$12 sps:$4 sm:$0xff]  }
 0x37d   :  { %3644 = vmatprep.subr.bf16.mxu1 %v4211_v0 }
 0x37e   :  { %1864 = vmatpush1.bf16.msra.mxu0 %v4376_v28  ;;  %v3887_v28 = vld [vmem:[#allocation14 + $0x80] ss:$12 sps:$4 sm:$0xff]  }
 0x37f   :  { %1865 = vmatprep.subr.bf16.mxu0 %v4379_v30  ;;  %v3888_v30 = vld [vmem:[#allocation14 + $0x68] ss:$12 sps:$4 sm:$0xff]  }
 0x380   :  { %3645 = vmatpush3.bf16.msra.mxu1 %v3886_v27  ;;  %v4602_v27 = vld [vmem:[#allocation14 + $0x18] ss:$12 sps:$4 sm:$0xff]  }
 0x381   :  { %3646 = vmatprep.subr.bf16.mxu1 %v4211_v0 }
 0x382   :  { %1866 = vmatpush1.bf16.msra.mxu0 %v4386_v31  ;;  %v3889_v31 = vld [vmem:[#allocation14 + $0x50] ss:$12 sps:$4 sm:$0xff]  }
 0x383   :  { %1867 = vmatprep.subr.bf16.mxu0 %v4389_v33  ;;  %v3890_v33 = vld [vmem:[#allocation14 + $0x38] ss:$12 sps:$4 sm:$0xff]  }
 0x384   :  { %3647 = vmatpush3.bf16.msra.mxu1 %v3887_v28  ;;  %v3920_v28 = vld [vmem:[#allocation14 + $0x20] ss:$12 sps:$4 sm:$0xff]  }
 0x385   :  { %3648 = vmatprep.subr.bf16.mxu1 %v4211_v0 }
 0x386   :  { %1868 = vmatpush1.bf16.msra.mxu0 %v4393_v34  ;;  %v3891_v34 = vld [vmem:[#allocation14 + $0x20] ss:$12 sps:$4 sm:$0xff]  }
 0x387   :  { %1869 = vmatprep.subr.bf16.mxu0 %v4396_v36  ;;  %v3892_v36 = vld [vmem:[#allocation14 + $0x8] ss:$12 sps:$4 sm:$0xff]  }
 0x388   :  { %3649 = vmatpush3.bf16.msra.mxu1 %v3888_v30  ;;  %v4606_v30 = vld [vmem:[#allocation14 + $0x4] ss:$12 sps:$4 sm:$0xff]  }
 0x389   :  { %3650 = vmatprep.subr.bf16.mxu1 %v4211_v0 }
 0x38a   :  { %1870 = vmatpush1.bf16.msra.mxu0 %v4400_v37 }
 0x38b   :  { %1871 = vmatprep.subr.bf16.mxu0 %v4403_v39 }
 0x38c   :  { %3651 = vmatpush3.bf16.msra.mxu1 %v3889_v31  ;;  %v4609_v31 = vld [vmem:[#allocation14] ss:$12 sps:$4 sm:$0xff]  }
 0x38d   :  { %3652 = vmatprep.subr.bf16.mxu1 %v4211_v0 }
 0x38e   :  { %1872 = vmatpush1.bf16.msra.mxu0 %v4407_v40 }
 0x38f   :  { %1873 = vmatprep.subr.bf16.mxu0 %v4410_v42 }
 0x390   :  { %3653 = vmatpush3.bf16.msra.mxu1 %v3890_v33  ;;  %v3924_v33 = vld [vmem:[#allocation14 + $0x8] ss:$12 sps:$4 sm:$0xff]  }
 0x391   :  { %3654 = vmatprep.subr.bf16.mxu1 %v4211_v0 }
 0x392   :  { %1874 = vmatpush1.bf16.msra.mxu0 %v4414_v43 }
 0x393   :  { %1875 = vmatprep.subr.bf16.mxu0 %v4417_v45 }
 0x394   :  { %3655 = vmatpush3.bf16.msra.mxu1 %v3891_v34 }
 0x395   :  { %3656 = vmatprep.subr.bf16.mxu1 %v4211_v0 }
 0x396   :  { %1876 = vmatpush1.bf16.msra.mxu0 %v4421_v47 }
 0x397   :  { %2143 = vmatprep.subr.bf16.mxu0 %v4559_v50 }
 0x398   :  { %3657 = vmatpush3.bf16.msra.mxu1 %v3892_v36 }
 0x399   :  { %3662 = vmatprep.subr.bf16.mxu1 %v4211_v0 }
 0x439   :  { %v1615_v37 = vpop.f32.mrf.mxu0  ;;  %v1656_v39 = vpop.f32.mrf.mxu1 }
 0x43a   :  { %v1663_v40 = vrot.slane %v1615_v37, 6  ;;  %v1682_v15 = vadd.f32 %v1656_v39, %v4471_v58 }
 0x43b   :  { %v1617_v42 = vpop.f32.mrf.mxu0  ;;  %v3640_v43 = vpop.f32.mrf.mxu1 }
 0x43c   :  { %v1665_v45 = vadd.f32 %v1663_v40, %v4462_v20  ;;  %v1673_v10 = vrot.slane %v1617_v42, 6  ;;  %v1684_v17 = vrot.slane %v1682_v15, 6 }
 0x43d   :  { %v1619_v47 = vpop.f32.mrf.mxu0  ;;  %v1659_v8 = vpop.f32.mrf.mxu1 }
 0x43e   :  { %v3262_v9 = vmul.f32 -1.442695, %v1665_v45  ;;  %v1675_v11 = vadd.f32 %v1673_v10, %v4465_v49 }
 0x43f   :  { %v1620_v48 = vpop.f32.mrf.mxu0  ;;  %v3641_v6 = vpop.f32.mrf.mxu1 }
 0x440   :  { %3969 = vpow2.f32 %v3262_v9  ;;  %v3263_v12 = vmul.f32 -1.442695, %v1675_v11 }
 0x442   :  { %3971 = vpow2.f32 %v3263_v12 }
 0x44d   :  { %v3970_v13 = vpop.eup %3969 }
 0x44e   :  { %v1669_v14 = vadd.f32 1.0, %v3970_v13 }
 0x44f   :  { %v3972_v23 = vpop.eup %3971 }
 0x450   :  { %3973 = vrcp.f32 %v1669_v14  ;;  %v1679_v16 = vadd.f32 1.0, %v3972_v23 }
 0x452   :  { %3975 = vrcp.f32 %v1679_v16 }
 0x45d   :  { %v3974_v18 = vpop.eup %3973 }
 0x45e   :  { %v1686_v19 = vmul.f32 %v3974_v18, %v1684_v17 }
 0x45f   :  { %v3976_v22 = vpop.eup %3975 }
 0x460   :  { %v1687_v21 = vadd.f32 %v1686_v19, %v4474_v63  ;;  %v1689_v24 = vsub.f32 1.0, %v3976_v22  ;;  %v1694_v35 = vmul.f32 %v3976_v22, %v1692_v26 }
 0x462   :  { %3977 = vtanh.f32 %v1687_v21 }
 0x46f   :  { %v3978_v29 = vpop.eup %3977 }
 0x470   :  { %v1690_v32 = vmul.f32 %v3978_v29, %v1689_v24 }
 0x472   :  { %v4551_v38 = vadd.f32 %v1694_v35, %v1690_v32 }
 0x474   :  { %1696 = vst [vmem:[#allocation15] sm:$0x4] %v4551_v38  ;;  %v1697_v41 = vpack.c.bf16 %v4551_v38, %v4551_v38  ;;  %v1972_v22 = vrot.slane %v4551_v38, 7  ;;  %v3925_v38 = vld [vmem:[#allocation14 + $0xb0] ss:$12 sps:$4 sm:$0xff]  }
 0x476   :  { %v1731_v44 = vrot.slane %v1697_v41, 1 }
 0x478   :  { %1894 = vmatmul.mubr.bf16.vlgmr.msra.gmra.mxu0 %v1731_v44  ;;  %3659 = vmatmul.mubr.bf16.vlgmr.msra.gmra.mxu1 %v1731_v44 }
 0x479   :  { %2175 = vmatprep.mubr.bf16.mxu0 %v4213_v46  ;;  %3678 = vmatprep.mubr.msk.bf16.mxu1 %vm4212_vm0, %v4211_v0 }
 0x47a   :  { %2144 = vmatpush1.bf16.msra.mxu0 %v4561_v51  ;;  %3663 = vmatpush3.bf16.msra.mxu1 %v3896_v52  ;;  %v3926_v52 = vld [vmem:[#allocation14 + $0x98] ss:$12 sps:$4 sm:$0xff]  }
 0x47b   :  { %3664 = vmatprep.subr.bf16.mxu1 %v4211_v0  ;;  %2145 = vmatprep.subr.bf16.mxu0 %v4565_v53 }
 0x47e   :  { %2146 = vmatpush1.bf16.msra.mxu0 %v4568_v54  ;;  %3665 = vmatpush3.bf16.msra.mxu1 %v3900_v55  ;;  %v3927_v55 = vld [vmem:[#allocation14 + $0x80] ss:$12 sps:$4 sm:$0xff]  }
 0x47f   :  { %3666 = vmatprep.subr.bf16.mxu1 %v4211_v0  ;;  %2147 = vmatprep.subr.bf16.mxu0 %v4572_v56 }
 0x482   :  { %2148 = vmatpush1.bf16.msra.mxu0 %v4575_v57  ;;  %3667 = vmatpush3.bf16.msra.mxu1 %v3904_v59  ;;  %v3928_v59 = vld [vmem:[#allocation14 + $0x68] ss:$12 sps:$4 sm:$0xff]  }
 0x483   :  { %2149 = vmatprep.subr.bf16.mxu0 %v4578_v60  ;;  %3668 = vmatprep.subr.bf16.mxu1 %v4211_v0 }
 0x486   :  { %2150 = vmatpush1.bf16.msra.mxu0 %v4581_v61  ;;  %3669 = vmatpush3.bf16.msra.mxu1 %v3908_v62  ;;  %v3929_v62 = vld [vmem:[#allocation14 + $0x50] ss:$12 sps:$4 sm:$0xff]  }
 0x487   :  { %2151 = vmatprep.subr.bf16.mxu0 %v4585_v1  ;;  %3670 = vmatprep.subr.bf16.mxu1 %v4211_v0 }
 0x48a   :  { %2152 = vmatpush1.bf16.msra.mxu0 %v4588_v2  ;;  %3671 = vmatpush3.bf16.msra.mxu1 %v3912_v3  ;;  %v3930_v3 = vld [vmem:[#allocation14 + $0x38] ss:$12 sps:$4 sm:$0xff]  }
 0x48b   :  { %2153 = vmatprep.subr.bf16.mxu0 %v4592_v4  ;;  %3672 = vmatprep.subr.bf16.mxu1 %v4211_v0 }
 0x48e   :  { %2154 = vmatpush1.bf16.msra.mxu0 %v4595_v5  ;;  %3673 = vmatpush3.bf16.msra.mxu1 %v3916_v7  ;;  %v3931_v7 = vld [vmem:[#allocation14 + $0x20] ss:$12 sps:$4 sm:$0xff]  }
 0x48f   :  { %2155 = vmatprep.subr.bf16.mxu0 %v4599_v25  ;;  %3674 = vmatprep.subr.bf16.mxu1 %v4211_v0 }
 0x492   :  { %2156 = vmatpush1.bf16.msra.mxu0 %v4602_v27  ;;  %3675 = vmatpush3.bf16.msra.mxu1 %v3920_v28  ;;  %v3932_v28 = vld [vmem:[#allocation14 + $0x8] ss:$12 sps:$4 sm:$0xff]  }
 0x493   :  { %2157 = vmatprep.subr.bf16.mxu0 %v4606_v30  ;;  %3676 = vmatprep.subr.bf16.mxu1 %v4211_v0 }
 0x496   :  { %2158 = vmatpush1.bf16.msra.mxu0 %v4609_v31  ;;  %3677 = vmatpush3.bf16.msra.mxu1 %v3924_v33 }
 0x497   :  { %2423 = vmatprep.subr.bf16.mxu0 %v4559_v50  ;;  %3682 = vmatprep.subr.bf16.mxu1 %v4211_v0 }
 0x538   :  { %v1895_v34 = vpop.f32.mrf.mxu0  ;;  %v1936_v36 = vpop.f32.mrf.mxu1 }
 0x539   :  { %v1943_v37 = vrot.slane %v1895_v34, 5  ;;  %v1962_v14 = vadd.f32 %v1936_v36, %v4471_v58 }
 0x53a   :  { %v1897_v39 = vpop.f32.mrf.mxu0  ;;  %v3660_v40 = vpop.f32.mrf.mxu1 }
 0x53b   :  { %v1945_v42 = vadd.f32 %v1943_v37, %v4462_v20  ;;  %v1953_v8 = vrot.slane %v1897_v39, 5  ;;  %v1964_v15 = vrot.slane %v1962_v14, 5 }
 0x53c   :  { %v1899_v43 = vpop.f32.mrf.mxu0  ;;  %v1939_v45 = vpop.f32.mrf.mxu1 }
 0x53d   :  { %v3288_v47 = vmul.f32 -1.442695, %v1945_v42  ;;  %v1955_v48 = vadd.f32 %v1953_v8, %v4465_v49 }
 0x53e   :  { %v1900_v9 = vpop.f32.mrf.mxu0  ;;  %v3661_v10 = vpop.f32.mrf.mxu1 }
 0x53f   :  { %3979 = vpow2.f32 %v3288_v47  ;;  %v3289_v6 = vmul.f32 -1.442695, %v1955_v48 }
 0x541   :  { %3981 = vpow2.f32 %v3289_v6 }
 0x54c   :  { %v3980_v11 = vpop.eup %3979 }
 0x54d   :  { %v1949_v12 = vadd.f32 1.0, %v3980_v11 }
 0x54e   :  { %v3982_v13 = vpop.eup %3981 }
 0x54f   :  { %3983 = vrcp.f32 %v1949_v12  ;;  %v1959_v23 = vadd.f32 1.0, %v3982_v13 }
 0x551   :  { %3985 = vrcp.f32 %v1959_v23 }
 0x55c   :  { %v3984_v16 = vpop.eup %3983 }
 0x55d   :  { %v1966_v17 = vmul.f32 %v3984_v16, %v1964_v15 }
 0x55e   :  { %v3986_v19 = vpop.eup %3985 }
 0x55f   :  { %v1967_v18 = vadd.f32 %v1966_v17, %v4474_v63  ;;  %v1969_v21 = vsub.f32 1.0, %v3986_v19  ;;  %v1974_v29 = vmul.f32 %v3986_v19, %v1972_v22 }
 0x561   :  { %3987 = vtanh.f32 %v1967_v18 }
 0x56e   :  { %v3988_v24 = vpop.eup %3987 }
 0x56f   :  { %v1970_v26 = vmul.f32 %v3988_v24, %v1969_v21 }
 0x571   :  { %v4621_v32 = vadd.f32 %v1974_v29, %v1970_v26 }
 0x573   :  { %1976 = vst [vmem:[#allocation15] sm:$0x8] %v4621_v32  ;;  %v1977_v35 = vpack.c.bf16 %v4621_v32, %v4621_v32  ;;  %v2254_v21 = vrot.slane %v4621_v32, 7  ;;  %v3933_v32 = vld [vmem:[#allocation14 + $0xb0] ss:$12 sps:$4 sm:$0xff]  }
 0x575   :  { %v2011_v41 = vshrl.u32 %v1977_v35, 16 }
 0x577   :  { %v2013_v44 = vrot.slane %v2011_v41, 1 }
 0x579   :  { %2176 = vmatmul.mubr.bf16.vlgmr.msra.gmra.mxu0 %v2013_v44  ;;  %3679 = vmatmul.mubr.bf16.vlgmr.msra.gmra.mxu1 %v2013_v44  ;;  %v3934_v44 = vld [vmem:[#allocation14 + $0x98] ss:$12 sps:$4 sm:$0xff]  }
 0x57a   :  { %2424 = vmatpush1.bf16.msra.mxu0 %v4561_v51  ;;  %2455 = vmatprep.mubr.bf16.mxu0 %v4213_v46 }
 0x57b   :  { %2425 = vmatprep.subr.bf16.mxu0 %v4565_v53  ;;  %3698 = vmatprep.mubr.msk.bf16.mxu1 %vm4212_vm0, %v4211_v0 }
 0x57c   :  { %3683 = vmatpush3.bf16.msra.mxu1 %v3925_v38  ;;  %v3935_v38 = vld [vmem:[#allocation14 + $0x80] ss:$12 sps:$4 sm:$0xff]  }
 0x57d   :  { %3684 = vmatprep.subr.bf16.mxu1 %v4211_v0 }
 0x57e   :  { %2426 = vmatpush1.bf16.msra.mxu0 %v4568_v54 }
 0x57f   :  { %2427 = vmatprep.subr.bf16.mxu0 %v4572_v56 }
 0x580   :  { %3685 = vmatpush3.bf16.msra.mxu1 %v3926_v52  ;;  %v3936_v52 = vld [vmem:[#allocation14 + $0x68] ss:$12 sps:$4 sm:$0xff]  }
 0x581   :  { %3686 = vmatprep.subr.bf16.mxu1 %v4211_v0 }
 0x582   :  { %2428 = vmatpush1.bf16.msra.mxu0 %v4575_v57 }
 0x583   :  { %2429 = vmatprep.subr.bf16.mxu0 %v4578_v60 }
 0x584   :  { %3687 = vmatpush3.bf16.msra.mxu1 %v3927_v55  ;;  %v3937_v55 = vld [vmem:[#allocation14 + $0x50] ss:$12 sps:$4 sm:$0xff]  }
 0x585   :  { %3688 = vmatprep.subr.bf16.mxu1 %v4211_v0 }
 0x586   :  { %2430 = vmatpush1.bf16.msra.mxu0 %v4581_v61 }
 0x587   :  { %2431 = vmatprep.subr.bf16.mxu0 %v4585_v1 }
 0x588   :  { %3689 = vmatpush3.bf16.msra.mxu1 %v3928_v59  ;;  %v3938_v59 = vld [vmem:[#allocation14 + $0x38] ss:$12 sps:$4 sm:$0xff]  }
 0x589   :  { %3690 = vmatprep.subr.bf16.mxu1 %v4211_v0 }
 0x58a   :  { %2432 = vmatpush1.bf16.msra.mxu0 %v4588_v2 }
 0x58b   :  { %2433 = vmatprep.subr.bf16.mxu0 %v4592_v4 }
 0x58c   :  { %3691 = vmatpush3.bf16.msra.mxu1 %v3929_v62  ;;  %v3940_v62 = vld [vmem:[#allocation14 + $0x8] ss:$12 sps:$4 sm:$0xff]  }
 0x58d   :  { %3692 = vmatprep.subr.bf16.mxu1 %v4211_v0 }
 0x58e   :  { %2434 = vmatpush1.bf16.msra.mxu0 %v4595_v5 }
 0x58f   :  { %2435 = vmatprep.subr.bf16.mxu0 %v4599_v25 }
 0x590   :  { %3693 = vmatpush3.bf16.msra.mxu1 %v3930_v3 }
 0x591   :  { %3694 = vmatprep.subr.bf16.mxu1 %v4211_v0 }
 0x592   :  { %2436 = vmatpush1.bf16.msra.mxu0 %v4602_v27 }
 0x593   :  { %2437 = vmatprep.subr.bf16.mxu0 %v4606_v30 }
 0x594   :  { %3695 = vmatpush3.bf16.msra.mxu1 %v3931_v7 }
 0x595   :  { %3696 = vmatprep.subr.bf16.mxu1 %v4211_v0 }
 0x596   :  { %2438 = vmatpush1.bf16.msra.mxu0 %v4609_v31 }
 0x597   :  { %2705 = vmatprep.subr.bf16.mxu0 %v4559_v50 }
 0x598   :  { %3697 = vmatpush3.bf16.msra.mxu1 %v3932_v28 }
 0x599   :  { %3702 = vmatprep.subr.bf16.mxu1 %v4211_v0 }
 0x639   :  { %v2177_v33 = vpop.f32.mrf.mxu0  ;;  %v2218_v34 = vpop.f32.mrf.mxu1 }
 0x63a   :  { %v2225_v36 = vrot.slane %v2177_v33, 4  ;;  %v2244_v13 = vadd.f32 %v2218_v34, %v4471_v58 }
 0x63b   :  { %v2179_v37 = vpop.f32.mrf.mxu0  ;;  %v3680_v39 = vpop.f32.mrf.mxu1 }
 0x63c   :  { %v2227_v40 = vadd.f32 %v2225_v36, %v4462_v20  ;;  %v2235_v47 = vrot.slane %v2179_v37, 4  ;;  %v2246_v23 = vrot.slane %v2244_v13, 4 }
 0x63d   :  { %v2181_v42 = vpop.f32.mrf.mxu0  ;;  %v2221_v43 = vpop.f32.mrf.mxu1 }
 0x63e   :  { %v3314_v45 = vmul.f32 -1.442695, %v2227_v40  ;;  %v2237_v10 = vadd.f32 %v2235_v47, %v4465_v49 }
 0x63f   :  { %v2182_v8 = vpop.f32.mrf.mxu0  ;;  %v3681_v9 = vpop.f32.mrf.mxu1 }
 0x640   :  { %3989 = vpow2.f32 %v3314_v45  ;;  %v3315_v48 = vmul.f32 -1.442695, %v2237_v10 }
 0x642   :  { %3991 = vpow2.f32 %v3315_v48 }
 0x64d   :  { %v3990_v6 = vpop.eup %3989 }
 0x64e   :  { %v2231_v11 = vadd.f32 1.0, %v3990_v6 }
 0x64f   :  { %v3992_v12 = vpop.eup %3991 }
 0x650   :  { %3993 = vrcp.f32 %v2231_v11  ;;  %v2241_v14 = vadd.f32 1.0, %v3992_v12 }
 0x652   :  { %3995 = vrcp.f32 %v2241_v14 }
 0x65d   :  { %v3994_v15 = vpop.eup %3993 }
 0x65e   :  { %v2248_v16 = vmul.f32 %v3994_v15, %v2246_v23 }
 0x65f   :  { %v3996_v18 = vpop.eup %3995 }
 0x660   :  { %v2249_v17 = vadd.f32 %v2248_v16, %v4474_v63  ;;  %v2251_v19 = vsub.f32 1.0, %v3996_v18  ;;  %v2256_v26 = vmul.f32 %v3996_v18, %v2254_v21 }
 0x662   :  { %3997 = vtanh.f32 %v2249_v17 }
 0x66f   :  { %v3998_v22 = vpop.eup %3997 }
 0x670   :  { %v2252_v24 = vmul.f32 %v3998_v22, %v2251_v19 }
 0x672   :  { %v4658_v29 = vadd.f32 %v2256_v26, %v2252_v24 }
 0x674   :  { %2258 = vst [vmem:[#allocation15] sm:$0x10] %v4658_v29  ;;  %v2259_v35 = vpack.c.bf16 %v4658_v29, %v4658_v29  ;;  %v2534_v17 = vrot.slane %v4658_v29, 7 }
 0x676   :  { %v2293_v41 = vrot.slane %v2259_v35, 2 }
 0x678   :  { %2456 = vmatmul.mubr.bf16.vlgmr.msra.gmra.mxu0 %v2293_v41  ;;  %3699 = vmatmul.mubr.bf16.vlgmr.msra.gmra.mxu1 %v2293_v41 }
 0x679   :  { %2706 = vmatpush1.bf16.msra.mxu0 %v4561_v51  ;;  %2737 = vmatprep.mubr.bf16.mxu0 %v4213_v46 }
 0x67a   :  { %2707 = vmatprep.subr.bf16.mxu0 %v4565_v53  ;;  %3718 = vmatprep.mubr.msk.bf16.mxu1 %vm4212_vm0, %v4211_v0 }
 0x67b   :  { %3703 = vmatpush3.bf16.msra.mxu1 %v3933_v32 }
 0x67c   :  { %3704 = vmatprep.subr.bf16.mxu1 %v4211_v0 }
 0x67d   :  { %2708 = vmatpush1.bf16.msra.mxu0 %v4568_v54 }
 0x67e   :  { %2709 = vmatprep.subr.bf16.mxu0 %v4572_v56 }
 0x67f   :  { %3705 = vmatpush3.bf16.msra.mxu1 %v3934_v44 }
 0x680   :  { %3706 = vmatprep.subr.bf16.mxu1 %v4211_v0 }
 0x681   :  { %2710 = vmatpush1.bf16.msra.mxu0 %v4575_v57 }
 0x682   :  { %2711 = vmatprep.subr.bf16.mxu0 %v4578_v60 }
 0x683   :  { %3707 = vmatpush3.bf16.msra.mxu1 %v3935_v38 }
 0x684   :  { %3708 = vmatprep.subr.bf16.mxu1 %v4211_v0 }
 0x685   :  { %2712 = vmatpush1.bf16.msra.mxu0 %v4581_v61 }
 0x686   :  { %2713 = vmatprep.subr.bf16.mxu0 %v4585_v1 }
 0x687   :  { %3709 = vmatpush3.bf16.msra.mxu1 %v3936_v52 }
 0x688   :  { %3710 = vmatprep.subr.bf16.mxu1 %v4211_v0 }
 0x689   :  { %2714 = vmatpush1.bf16.msra.mxu0 %v4588_v2 }
 0x68a   :  { %2715 = vmatprep.subr.bf16.mxu0 %v4592_v4 }
 0x68b   :  { %3711 = vmatpush3.bf16.msra.mxu1 %v3937_v55 }
 0x68c   :  { %3712 = vmatprep.subr.bf16.mxu1 %v4211_v0 }
 0x68d   :  { %2716 = vmatpush1.bf16.msra.mxu0 %v4595_v5 }
 0x68e   :  { %2717 = vmatprep.subr.bf16.mxu0 %v4599_v25 }
 0x68f   :  { %3713 = vmatpush3.bf16.msra.mxu1 %v3938_v59 }
 0x690   :  { %3714 = vmatprep.subr.bf16.mxu1 %v4211_v0 }
 0x691   :  { %2718 = vmatpush1.bf16.msra.mxu0 %v4602_v27 }
 0x692   :  { %2719 = vmatprep.subr.bf16.mxu0 %v4606_v30 }
 0x695   :  { %2720 = vmatpush1.bf16.msra.mxu0 %v4609_v31 }
 0x696   :  { %2985 = vmatprep.subr.bf16.mxu0 %v4559_v50  ;;  %v3939_v50 = vld [vmem:[#allocation14 + $0x20] ss:$12 sps:$4 sm:$0xff]  }
 0x697   :  { %3715 = vmatpush3.bf16.msra.mxu1 %v3939_v50 }
 0x698   :  { %3716 = vmatprep.subr.bf16.mxu1 %v4211_v0 }
 0x69b   :  { %3717 = vmatpush3.bf16.msra.mxu1 %v3940_v62 }
 0x69c   :  { %3722 = vmatprep.subr.bf16.mxu1 %v4211_v0 }
 0x738   :  { %v2457_v3 = vpop.f32.mrf.mxu0  ;;  %v2498_v7 = vpop.f32.mrf.mxu1 }
 0x739   :  { %v2505_v28 = vrot.slane %v2457_v3, 3  ;;  %v2524_v6 = vadd.f32 %v2498_v7, %v4471_v58 }
 0x73a   :  { %v2459_v33 = vpop.f32.mrf.mxu0  ;;  %v3700_v34 = vpop.f32.mrf.mxu1 }
 0x73b   :  { %v2507_v36 = vadd.f32 %v2505_v28, %v4462_v20  ;;  %v2515_v42 = vrot.slane %v2459_v33, 3  ;;  %v2526_v12 = vrot.slane %v2524_v6, 3 }
 0x73c   :  { %v2461_v37 = vpop.f32.mrf.mxu0  ;;  %v2501_v39 = vpop.f32.mrf.mxu1 }
 0x73d   :  { %v3340_v40 = vmul.f32 -1.442695, %v2507_v36  ;;  %v2517_v47 = vadd.f32 %v2515_v42, %v4465_v49 }
 0x73e   :  { %v2462_v43 = vpop.f32.mrf.mxu0  ;;  %v3701_v45 = vpop.f32.mrf.mxu1 }
 0x73f   :  { %3999 = vpow2.f32 %v3340_v40  ;;  %v3341_v8 = vmul.f32 -1.442695, %v2517_v47 }
 0x741   :  { %4001 = vpow2.f32 %v3341_v8 }
 0x74c   :  { %v4000_v9 = vpop.eup %3999 }
 0x74d   :  { %v2511_v10 = vadd.f32 1.0, %v4000_v9 }
 0x74e   :  { %v4002_v48 = vpop.eup %4001 }
 0x74f   :  { %4003 = vrcp.f32 %v2511_v10  ;;  %v2521_v11 = vadd.f32 1.0, %v4002_v48 }
 0x751   :  { %4005 = vrcp.f32 %v2521_v11 }
 0x75c   :  { %v4004_v13 = vpop.eup %4003 }
 0x75d   :  { %v2528_v14 = vmul.f32 %v4004_v13, %v2526_v12 }
 0x75e   :  { %v4006_v15 = vpop.eup %4005 }
 0x75f   :  { %v2529_v23 = vadd.f32 %v2528_v14, %v4474_v63  ;;  %v2531_v16 = vsub.f32 1.0, %v4006_v15  ;;  %v2536_v21 = vmul.f32 %v4006_v15, %v2534_v17 }
 0x761   :  { %4007 = vtanh.f32 %v2529_v23 }
 0x76e   :  { %v4008_v18 = vpop.eup %4007 }
 0x76f   :  { %v2532_v19 = vmul.f32 %v4008_v18, %v2531_v16 }
 0x771   :  { %v4695_v22 = vadd.f32 %v2536_v21, %v2532_v19 }
 0x773   :  { %2538 = vst [vmem:[#allocation15] sm:$0x20] %v4695_v22  ;;  %v2539_v24 = vpack.c.bf16 %v4695_v22, %v4695_v22  ;;  %v2816_v37 = vrot.slane %v4695_v22, 7  ;;  %v4029_v22 = vld [vmem:[%s4750_s11] sm:$0x1]  ;;  %s4170_s11 = scalar_lea.vmem %s3109_s24, 128 }
 0x774   :  { %p4171_p7 = scmp.ne.s32.totalorder %s3109_s24, %s4170_s11  ;;  %p4176_p9 = scmp.lt.s32.totalorder %s4170_s11, %s4170_s11 }
 0x775   :  { %v2573_v26 = vshrl.u32 %v2539_v24, 16 }
 0x776   :  { %p4177_p10 = por %p4176_p9, %p4175_p8 }
 0x777   :  { %v2575_v35 = vrot.slane %v2573_v26, 2 }
 0x778   :  { %p4178_p11 = pnand %p4177_p10, %p4171_p7 }
 0x779   :  { %2738 = vmatmul.mubr.bf16.vlgmr.msra.gmra.mxu0 %v2575_v35  ;;  %3719 = vmatmul.mubr.bf16.vlgmr.msra.gmra.mxu1 %v2575_v35 }
 0x77a   :  { %2986 = vmatpush1.bf16.msra.mxu0 %v4561_v51  ;;  %3017 = vmatprep.mubr.bf16.mxu0 %v4213_v46  ;;  %v3941_v46 = vld [vmem:[#allocation14 + $0xb0] ss:$12 sps:$4 sm:$0xff]   ;;  %v3942_v51 = vld [vmem:[#allocation14 + $0x98] ss:$12 sps:$4 sm:$0xff]  }
 0x77b   :  { %2987 = vmatprep.subr.bf16.mxu0 %v4565_v53  ;;  %3738 = vmatprep.mubr.msk.bf16.mxu1 %vm4212_vm0, %v4211_v0  ;;  %v3943_v53 = vld [vmem:[#allocation14 + $0x80] ss:$12 sps:$4 sm:$0xff]  }
 0x77c   :  { %3723 = vmatpush3.bf16.msra.mxu1 %v3941_v46 }
 0x77d   :  { %3724 = vmatprep.subr.bf16.mxu1 %v4211_v0 }
 0x77e   :  { %2988 = vmatpush1.bf16.msra.mxu0 %v4568_v54  ;;  %v3944_v54 = vld [vmem:[#allocation14 + $0x68] ss:$12 sps:$4 sm:$0xff]  }
 0x77f   :  { %2989 = vmatprep.subr.bf16.mxu0 %v4572_v56  ;;  %v3945_v56 = vld [vmem:[#allocation14 + $0x50] ss:$12 sps:$4 sm:$0xff]  }
 0x780   :  { %3725 = vmatpush3.bf16.msra.mxu1 %v3942_v51 }
 0x781   :  { %3726 = vmatprep.subr.bf16.mxu1 %v4211_v0 }
 0x782   :  { %2990 = vmatpush1.bf16.msra.mxu0 %v4575_v57  ;;  %v3946_v57 = vld [vmem:[#allocation14 + $0x38] ss:$12 sps:$4 sm:$0xff]  }
 0x783   :  { %2991 = vmatprep.subr.bf16.mxu0 %v4578_v60  ;;  %v3947_v60 = vld [vmem:[#allocation14 + $0x20] ss:$12 sps:$4 sm:$0xff]  }
 0x784   :  { %3727 = vmatpush3.bf16.msra.mxu1 %v3943_v53 }
 0x785   :  { %3728 = vmatprep.subr.bf16.mxu1 %v4211_v0 }
 0x786   :  { %2992 = vmatpush1.bf16.msra.mxu0 %v4581_v61  ;;  %v3948_v61 = vld [vmem:[#allocation14 + $0x8] ss:$12 sps:$4 sm:$0xff]  }
 0x787   :  { %2993 = vmatprep.subr.bf16.mxu0 %v4585_v1 }
 0x788   :  { %3729 = vmatpush3.bf16.msra.mxu1 %v3944_v54 }
 0x789   :  { %3730 = vmatprep.subr.bf16.mxu1 %v4211_v0 }
 0x78a   :  { %2994 = vmatpush1.bf16.msra.mxu0 %v4588_v2 }
 0x78b   :  { %2995 = vmatprep.subr.bf16.mxu0 %v4592_v4 }
 0x78c   :  { %3731 = vmatpush3.bf16.msra.mxu1 %v3945_v56 }
 0x78d   :  { %3732 = vmatprep.subr.bf16.mxu1 %v4211_v0 }
 0x78e   :  { %2996 = vmatpush1.bf16.msra.mxu0 %v4595_v5 }
 0x78f   :  { %2997 = vmatprep.subr.bf16.mxu0 %v4599_v25 }
 0x790   :  { %3733 = vmatpush3.bf16.msra.mxu1 %v3946_v57 }
 0x791   :  { %3734 = vmatprep.subr.bf16.mxu1 %v4211_v0 }
 0x792   :  { %2998 = vmatpush1.bf16.msra.mxu0 %v4602_v27 }
 0x793   :  { %2999 = vmatprep.subr.bf16.mxu0 %v4606_v30 }
 0x794   :  { %3735 = vmatpush3.bf16.msra.mxu1 %v3947_v60 }
 0x795   :  { %3736 = vmatprep.subr.bf16.mxu1 %v4211_v0 }
 0x796   :  { %3000 = vmatpush1.bf16.msra.mxu0 %v4609_v31 }
 0x798   :  { %3737 = vmatpush3.bf16.msra.mxu1 %v3948_v61 }
 0x839   :  { %v2739_v1 = vpop.f32.mrf.mxu0  ;;  %v2780_v2 = vpop.f32.mrf.mxu1 }
 0x83a   :  { %v2787_v4 = vrot.slane %v2739_v1, 2  ;;  %v2806_v50 = vadd.f32 %v2780_v2, %v4471_v58 }
 0x83b   :  { %v2741_v5 = vpop.f32.mrf.mxu0  ;;  %v3720_v25 = vpop.f32.mrf.mxu1 }
 0x83c   :  { %v2789_v27 = vadd.f32 %v2787_v4, %v4462_v20  ;;  %v2797_v41 = vrot.slane %v2741_v5, 2  ;;  %v2808_v3 = vrot.slane %v2806_v50, 2 }
 0x83d   :  { %v2743_v30 = vpop.f32.mrf.mxu0  ;;  %v2783_v31 = vpop.f32.mrf.mxu1 }
 0x83e   :  { %v3366_v29 = vmul.f32 -1.442695, %v2789_v27  ;;  %v2799_v38 = vadd.f32 %v2797_v41, %v4465_v49 }
 0x83f   :  { %v2744_v32 = vpop.f32.mrf.mxu0  ;;  %v3721_v44 = vpop.f32.mrf.mxu1 }
 0x840   :  { %4009 = vpow2.f32 %v3366_v29  ;;  %v3367_v52 = vmul.f32 -1.442695, %v2799_v38 }
 0x842   :  { %4011 = vpow2.f32 %v3367_v52 }
 0x84d   :  { %v4010_v0 = vpop.eup %4009 }
 0x84e   :  { %v2793_v55 = vadd.f32 1.0, %v4010_v0 }
 0x84f   :  { %v4012_v59 = vpop.eup %4011 }
 0x850   :  { %4013 = vrcp.f32 %v2793_v55  ;;  %v2803_v62 = vadd.f32 1.0, %v4012_v59 }
 0x852   :  { %4015 = vrcp.f32 %v2803_v62 }
 0x85d   :  { %v4014_v7 = vpop.eup %4013 }
 0x85e   :  { %v2810_v28 = vmul.f32 %v4014_v7, %v2808_v3 }
 0x85f   :  { %v4016_v34 = vpop.eup %4015 }
 0x860   :  { %v2811_v33 = vadd.f32 %v2810_v28, %v4474_v63  ;;  %v2813_v36 = vsub.f32 1.0, %v4016_v34  ;;  %v2818_v42 = vmul.f32 %v4016_v34, %v2816_v37 }
 0x862   :  { %4017 = vtanh.f32 %v2811_v33 }
 0x86f   :  { %v4018_v39 = vpop.eup %4017 }
 0x870   :  { %v2814_v40 = vmul.f32 %v4018_v39, %v2813_v36 }
 0x872   :  { %v2819_v43 = vadd.f32 %v2818_v42, %v2814_v40 }
 0x874   :  { %2820 = vst [vmem:[#allocation15] sm:$0x40] %v2819_v43  ;;  %v2821_v45 = vpack.c.bf16 %v2819_v43, %v2819_v43  ;;  %v3096_v53 = vrot.slane %v2819_v43, 7 }
 0x876   :  { %v2855_v47 = vrot.slane %v2821_v45, 3 }
 0x878   :  { %3018 = vmatmul.mubr.bf16.vlgmr.msra.gmra.mxu0 %v2855_v47  ;;  %3739 = vmatmul.mubr.bf16.vlgmr.msra.gmra.mxu1 %v2855_v47 }
 0x938   :  { %v3019_v58 = vpop.f32.mrf.mxu0  ;;  %v3060_v8 = vpop.f32.mrf.mxu1 }
 0x939   :  { %v3067_v9 = vrot.slane %v3019_v58, 1 }
 0x93a   :  { %v3021_v10 = vpop.f32.mrf.mxu0  ;;  %v3740_v48 = vpop.f32.mrf.mxu1 }
 0x93b   :  { %v3069_v6 = vadd.f32 %v3067_v9, %v4462_v20  ;;  %v3077_v14 = vrot.slane %v3021_v10, 1  ;;  %v3086_v20 = vadd.f32 %v4029_v22, %v3060_v8 }
 0x93c   :  { %v3023_v11 = vpop.f32.mrf.mxu0  ;;  %v3063_v12 = vpop.f32.mrf.mxu1 }
 0x93d   :  { %v3392_v13 = vmul.f32 -1.442695, %v3069_v6  ;;  %v3079_v16 = vadd.f32 %v3077_v14, %v4465_v49  ;;  %v3088_v26 = vrot.slane %v3086_v20, 1 }
 0x93e   :  { %v3024_v23 = vpop.f32.mrf.mxu0  ;;  %v3741_v15 = vpop.f32.mrf.mxu1 }
 0x93f   :  { %4019 = vpow2.f32 %v3392_v13  ;;  %v3393_v17 = vmul.f32 -1.442695, %v3079_v16 }
 0x941   :  { %4021 = vpow2.f32 %v3393_v17 }
 0x94c   :  { %v4020_v18 = vpop.eup %4019 }
 0x94d   :  { %v3073_v19 = vadd.f32 1.0, %v4020_v18 }
 0x94e   :  { %v4022_v21 = vpop.eup %4021 }
 0x94f   :  { %4023 = vrcp.f32 %v3073_v19  ;;  %v3083_v24 = vadd.f32 1.0, %v4022_v21 }
 0x951   :  { %4025 = vrcp.f32 %v3083_v24 }
 0x95c   :  { %v4024_v35 = vpop.eup %4023 }
 0x95d   :  { %v3090_v46 = vmul.f32 %v4024_v35, %v3088_v26 }
 0x95e   :  { %v4026_v49 = vpop.eup %4025 }
 0x95f   :  { %v3091_v51 = vadd.f32 %v3090_v46, %v4474_v63  ;;  %v3093_v54 = vsub.f32 1.0, %v4026_v49  ;;  %v3098_v60 = vmul.f32 %v4026_v49, %v3096_v53 }
 0x961   :  { %4027 = vtanh.f32 %v3091_v51 }
 0x96e   :  { %v4028_v56 = vpop.eup %4027 }
 0x96f   :  { %v3094_v57 = vmul.f32 %v4028_v56, %v3093_v54 }
 0x971   :  { %v3099_v61 = vadd.f32 %v3098_v60, %v3094_v57 }
 0x973   :  { %3101 = vst [vmem:[#allocation2 - $0x7] sm:$0x80] %v3099_v61  ;;  %3100 = vst [vmem:[#allocation15] sm:$0x80] %v3099_v61 }
 0x974   :  { %4181 = shalt.err (!%p4178_p11)
}
 0x975   :  { %3111 = dma.vmem_to_hbm [thread:$0]  %s3109_s24, 128, %s4751_s12, [#allocation5]  }
 0x976   :  { %4198 = dma.done.wait [#allocation5], 128  }
 0x977   :  { %4199 = vsyncadd [#allocation5], 4294967168 }
 0x978   :  { %3115 = vsyncpa [#allocation4], 1 }
 0x979   :  { %3116 = vsyncpa [#allocation7], 1 }
 0x97a   :  { %3117 = vsyncpa [#allocation10], 1 }
 0x97b   :  { %3118 = vsyncpa [#allocation13], 1 }
 0x97c   :  { %3119 = vsyncpa [#allocation5], 1 }

</bundles_post_ra>
